<compile_context>
chip_gen: v7x
topology: tpu7x:2x2x1
jax: 0.10.0
libtpu: 0.0.40
codegen_flags: <defaults>
</compile_context>

<pallas_src>
import jax
import jax.numpy as jnp
from jax.experimental import pallas as pl
from jax.experimental.pallas import tpu as pltpu


def _round_up(x, m):
    return ((x + m - 1) // m) * m


def _cdiv(a, b):
    return -(-a // b)


# ---------------------------------------------------------------------------
# Kernels
# ---------------------------------------------------------------------------

def channel_mix_kernel_fused(x_ref, xprev_ref, maa_k_ref, maa_r_ref,
                             wk_ref, wr_ref, wv_ref, y_ref,
                             xk_scr, sig_r_scr):
    """Receptance fused: Wr^T resident in VMEM, gate computed once per row tile."""
    f = pl.program_id(1)

    @pl.when(f == 0)
    def _init():
        x = x_ref[...].astype(jnp.float32)
        xx = xprev_ref[...].astype(jnp.float32) - x            # token-shift delta
        xk = x + xx * maa_k_ref[...]                           # broadcast (1, Dp)
        xr = x + xx * maa_r_ref[...]
        xk_scr[...] = xk.astype(xk_scr.dtype)                  # cached for all f steps
        r = jnp.dot(xr.astype(wr_ref.dtype), wr_ref[...],
                    preferred_element_type=jnp.float32)
        sig_r_scr[...] = jax.nn.sigmoid(r).astype(sig_r_scr.dtype)
        y_ref[...] = jnp.zeros_like(y_ref)                     # output doubles as kv acc

    # key -> relu -> square -> partial value, accumulated over F tiles into y_ref.
    k = jnp.dot(xk_scr[...], wk_ref[...], preferred_element_type=jnp.float32)
    k = jnp.maximum(k, 0.0)
    k = k * k                                                  # f32 elementwise (v5e-safe)
    y_ref[...] += jnp.dot(k.astype(wv_ref.dtype), wv_ref[...],
                          preferred_element_type=jnp.float32)

    @pl.when(f == pl.num_programs(1) - 1)
    def _finalize():
        y_ref[...] = sig_r_scr[...].astype(jnp.float32) * y_ref[...]


def channel_mix_kernel_gated(xk_ref, sig_r_ref, wk_ref, wv_ref, y_ref):
    """Receptance gate streamed in: only Wk/Wv blocks are VMEM-resident."""
    f = pl.program_id(1)

    @pl.when(f == 0)
    def _init():
        y_ref[...] = jnp.zeros_like(y_ref)

    k = jnp.dot(xk_ref[...], wk_ref[...], preferred_element_type=jnp.float32)
    k = jnp.maximum(k, 0.0)
    k = k * k
    y_ref[...] += jnp.dot(k.astype(wv_ref.dtype), wv_ref[...],
                          preferred_element_type=jnp.float32)

    @pl.when(f == pl.num_programs(1) - 1)
    def _finalize():
        y_ref[...] = sig_r_ref[...].astype(jnp.float32) * y_ref[...]


# ---------------------------------------------------------------------------
# Parameter prep / tile selection
# ---------------------------------------------------------------------------

def _pick_f_tile(f128, block_f):
    """Pick the f tile (multiple of 128) and a padded F with f_pad % tf == 0."""
    block_f = max(128, _round_up(block_f, 128))
    if f128 <= block_f:
        return f128, f128
    tf = block_f
    f_pad = _round_up(f128, tf)
    if (f_pad - f128) * 4 > f128:          # >25% wasted columns -> use a divisor
        tf = block_f
        while f128 % tf:
            tf -= 128
        f_pad = f128
    return tf, f_pad


def prepare_channel_mix_params(time_maa_k, time_maa_r,
                               w_key, w_receptance, w_value,
                               matmul_dtype=jnp.bfloat16, block_f=512):
    """One-time prep: transpose to (in, out), pad D/F to lane-dense sizes, cast."""
    d_ffn, d_model = w_key.shape
    assert w_receptance.shape == (d_model, d_model)
    assert w_value.shape == (d_model, d_ffn)
    d_pad = _round_up(d_model, 128)
    tf, f_pad = _pick_f_tile(_round_up(d_ffn, 128), block_f)

    def pad2(a, rows, cols):
        return jnp.pad(a, ((0, rows - a.shape[0]), (0, cols - a.shape[1])))

    maa_k = time_maa_k.reshape(1, d_model).astype(jnp.float32)
    maa_r = time_maa_r.reshape(1, d_model).astype(jnp.float32)
    return dict(
        d_model=d_model, d_ffn=d_ffn, d_pad=d_pad, f_pad=f_pad, tf=tf,
        matmul_dtype=matmul_dtype,
        maa_k_vec=maa_k, maa_r_vec=maa_r,
        maa_k=pad2(maa_k, 1, d_pad), maa_r=pad2(maa_r, 1, d_pad),
        wk_t=pad2(w_key.T, d_pad, f_pad).astype(matmul_dtype),          # (Dp, Fp)
        wr_t=pad2(w_receptance.T, d_pad, d_pad).astype(matmul_dtype),   # (Dp, Dp)
        wv_t=pad2(w_value.T, f_pad, d_pad).astype(matmul_dtype),        # (Fp, Dp)
    )


def _vmem_budget():
    capacity = 64 * 1024 * 1024            # conservative (v7x) fallback
    try:
        cap = int(pltpu.get_tpu_info().vmem_capacity_bytes)
        if cap > 0:
            capacity = cap
    except Exception:
        pass
    vmem_limit = int(capacity * 0.87)      # headroom for Mosaic internal scratch
    tile_budget = int(vmem_limit * 0.85)   # margin for estimate slop / cast temps
    return vmem_limit, tile_budget


def _row_cost(d_pad, tf, mm_b, act_b, sig_b, fused):
    """(fixed_bytes, bytes_per_row) VMEM-resident estimate for one row tile."""
    fixed = 2 * d_pad * tf * mm_b          # Wk^T block (double-buffered)
    fixed += 2 * tf * d_pad * mm_b         # Wv^T block (double-buffered)
    per_row = 2 * d_pad * 4                # y output tile (f32, 2 buffers)
    per_row += d_pad * 4                   # partial (tm, d_pad) f32 matmul result
    per_row += tf * (8 + mm_b)             # (tm, tf) key intermediates (f32 + cast)
    per_row += d_pad * mm_b + d_pad * sig_b  # xk + sigmoid(r) (scratch or stream)
    if fused:
        fixed += d_pad * d_pad * mm_b      # resident Wr^T (single-buffered)
        per_row += 2 * d_pad * act_b       # x, x_prev tiles (single-buffered)
    return fixed, per_row


# ---------------------------------------------------------------------------
# Wrapper
# ---------------------------------------------------------------------------

def channel_mix(x, params, state=None, need_state=True,
                block_m=1024, r_mode="auto", act_dtype=None):
    """x: (B, T, D) float32.  params: from prepare_channel_mix_params.

    r_mode: "auto" | "fused" | "gated"  (see module docstring).
    act_dtype: dtype used to stream x / x_prev in the fused path (default x.dtype).
    """
    B, T, D = x.shape
    assert D == params["d_model"]
    d_pad, f_pad, tf0 = params["d_pad"], params["f_pad"], params["tf"]
    mm_dtype = params["matmul_dtype"]
    mm_b = jnp.dtype(mm_dtype).itemsize
    act_dtype = x.dtype if act_dtype is None else jnp.dtype(act_dtype)
    act_b = jnp.dtype(act_dtype).itemsize
    sig_dtype = jnp.float32 if mm_b >= 4 else jnp.bfloat16
    sig_b = jnp.dtype(sig_dtype).itemsize

    M = B * T
    vmem_limit, tile_budget = _vmem_budget()
    block_m = _round_up(max(block_m, 8), 8)
    m_ceiling = _round_up(M, 8)

    def pick(fused):
        t = tf0
        while True:
            fixed, per_row = _row_cost(d_pad, t, mm_b, act_b, sig_b, fused)
            avail = tile_budget - fixed
            tm = (avail // per_row) // 8 * 8 if avail > 0 else 0
            tm = min(int(tm), block_m, m_ceiling)
            if tm >= 8 or t <= 128:
                return max(tm, 8), t
            nt = t // 2
            if nt % 128 or f_pad % nt:
                nt = 128
            t = nt

    if r_mode == "fused":
        use_fused = True
        tm, tf = pick(True)
    elif r_mode == "gated":
        use_fused = False
        tm, tf = pick(False)
    else:
        tm_f, tf_f = pick(True)
        tm_g, tf_g = pick(False)
        use_fused = tm_f >= tm_g
        tm, tf = (tm_f, tf_f) if use_fused else (tm_g, tf_g)

    m_pad = _round_up(M, tm)
    if m_pad == tm and M > 8:
        # Guarantee >= 2 row tiles so the "parallel" axis can shard across
        # TensorCores (v7x megacore); harmless on single-TC chips.
        tm = _round_up(_cdiv(M, 2), 8)
        m_pad = _round_up(M, tm)
    grid = (m_pad // tm, f_pad // tf)

    # Token shift (pure layout), done once in the wrapper:
    # x_prev = ZeroPad2d((0,0,1,-1))(x), or [state, x[:, :-1]].
    if state is None:
        first = jnp.zeros((B, 1, D), x.dtype)
    else:
        first = state.reshape(B, 1, D).astype(x.dtype)
    x_prev = jnp.concatenate([first, x[:, :-1]], axis=1)

    def rows(a, dtype):
        a = a.reshape(M, D).astype(dtype)
        return jnp.pad(a, ((0, m_pad - M), (0, d_pad - D)))

    out_shape = jax.ShapeDtypeStruct((m_pad, d_pad), jnp.float32)
    out_spec = pl.BlockSpec((tm, d_pad), lambda i, f: (i, 0))
    wk_spec = pl.BlockSpec((d_pad, tf), lambda i, f: (0, f))
    wv_spec = pl.BlockSpec((tf, d_pad), lambda i, f: (f, 0))
    cparams = pltpu.CompilerParams(
        dimension_semantics=("parallel", "arbitrary"),
        vmem_limit_bytes=vmem_limit)

    def row_spec(single_buffer):
        kw = dict(pipeline_mode=pl.Buffered(1)) if single_buffer else {}
        return pl.BlockSpec((tm, d_pad), lambda i, f: (i, 0), **kw)

    if use_fused:
        x2 = rows(x, act_dtype)
        xp2 = rows(x_prev, act_dtype)

        def call(single_buffer):
            wr_kw = dict(pipeline_mode=pl.Buffered(1)) if single_buffer else {}
            return pl.pallas_call(
                channel_mix_kernel_fused,
                out_shape=out_shape,
                grid_spec=pltpu.PrefetchScalarGridSpec(
                    num_scalar_prefetch=0,
                    grid=grid,
                    in_specs=[
                        row_spec(single_buffer),                          # x rows
                        row_spec(single_buffer),                          # x_prev rows
                        pl.BlockSpec((1, d_pad), lambda i, f: (0, 0)),    # time_maa_k
                        pl.BlockSpec((1, d_pad), lambda i, f: (0, 0)),    # time_maa_r
                        wk_spec,                                          # Wk^T block
                        pl.BlockSpec((d_pad, d_pad), lambda i, f: (0, 0),
                                     **wr_kw),                            # Wr^T (resident)
                        wv_spec,                                          # Wv^T block
                    ],
                    out_specs=out_spec,
                    scratch_shapes=[
                        pltpu.VMEM((tm, d_pad), mm_dtype),    # cached xk
                        pltpu.VMEM((tm, d_pad), sig_dtype),   # cached sigmoid(r)
                    ],
                ),
                compiler_params=cparams,
            )(x2, xp2, params["maa_k"], params["maa_r"],
              params["wk_t"], params["wr_t"], params["wv_t"])
    else:
        # Receptance gate evicted from the kernel (v7x / large-D path):
        # tiny D x D matmul handled by XLA, sigmoid(r) streamed per row tile.
        xf = x.astype(jnp.float32)
        xx = x_prev.astype(jnp.float32) - xf
        xk = xf + xx * params["maa_k_vec"].reshape(1, 1, D)
        xr = xf + xx * params["maa_r_vec"].reshape(1, 1, D)
        xk2 = rows(xk, mm_dtype)
        xr2 = rows(xr, mm_dtype)
        r = jnp.dot(xr2, params["wr_t"], preferred_element_type=jnp.float32)
        sig2 = jax.nn.sigmoid(r).astype(sig_dtype)

        def call(single_buffer):
            return pl.pallas_call(
                channel_mix_kernel_gated,
                out_shape=out_shape,
                grid_spec=pltpu.PrefetchScalarGridSpec(
                    num_scalar_prefetch=0,
                    grid=grid,
                    in_specs=[
                        row_spec(single_buffer),   # xk rows
                        row_spec(single_buffer),   # sigmoid(r) rows
                        wk_spec,                   # Wk^T block
                        wv_spec,                   # Wv^T block
                    ],
                    out_specs=out_spec,
                ),
                compiler_params=cparams,
            )(xk2, sig2, params["wk_t"], params["wv_t"])

    try:
        y_pad = call(True)
    except Exception:
        y_pad = call(False)   # fall back to default double-buffering everywhere

    y = y_pad[:M, :D].reshape(B, T, D).astype(x.dtype)
    if need_state:
        return y, x[:, -1]
    return y


# ---------------------------------------------------------------------------
# Pure-JAX reference (matches the PyTorch forward)
# ---------------------------------------------------------------------------

def channel_mix_ref(x, time_maa_k, time_maa_r, w_key, w_receptance, w_value,
                    state=None):
    B, T, D = x.shape
    first = jnp.zeros((B, 1, D), x.dtype) if state is None else state[:, None, :]
    xx = jnp.concatenate([first, x[:, :-1]], axis=1) - x
    xk = x + xx * time_maa_k.reshape(1, 1, D)
    xr = x + xx * time_maa_r.reshape(1, 1, D)
    k = jnp.maximum(xk @ w_key.T, 0.0) ** 2
    kv = k @ w_value.T
    y = jax.nn.sigmoid(xr @ w_receptance.T) * kv
    return y, x[:, -1]


if __name__ == "__main__":
    d_model = 32
    expand = 3.5
    d_ffn = int(d_model * expand)     # 112
    B, T = 2, 8

    key = jax.random.PRNGKey(0)
    k0, k1, k2, k3, k4, k5, k6 = jax.random.split(key, 7)

    x = jax.random.normal(k0, (B, T, d_model), dtype=jnp.float32)
    time_maa_k = jax.random.normal(k1, (1, 1, d_model), dtype=jnp.float32) * 0.1
    time_maa_r = jax.random.normal(k2, (1, 1, d_model), dtype=jnp.float32) * 0.1
    # nn.Linear weights, PyTorch layout (out_features, in_features)
    w_key = jax.random.normal(k3, (d_ffn, d_model), jnp.float32) * d_model ** -0.5
    w_receptance = jax.random.normal(k4, (d_model, d_model), jnp.float32) * d_model ** -0.5
    w_value = jax.random.normal(k5, (d_model, d_ffn), jnp.float32) * d_ffn ** -0.5

    y_ref, state_ref = channel_mix_ref(x, time_maa_k, time_maa_r,
                                       w_key, w_receptance, w_value)

    # 1) f32 matmuls, fused receptance (Wr resident): tight tolerance.
    params_f32 = prepare_channel_mix_params(time_maa_k, time_maa_r, w_key,
                                            w_receptance, w_value,
                                            matmul_dtype=jnp.float32)
    y32, s32 = channel_mix(x, params_f32, r_mode="fused")
    jax.block_until_ready((y32, s32))
    assert y32.shape == (B, T, d_model) and s32.shape == (B, d_model)
    assert jnp.allclose(y32, y_ref, atol=1e-4, rtol=1e-4)
    assert jnp.allclose(s32, state_ref)

    # 2) f32, gate streamed from outside the kernel (large-D / v7x path).
    yg, _ = channel_mix(x, params_f32, r_mode="gated")
    jax.block_until_ready(yg)
    assert jnp.allclose(yg, y_ref, atol=1e-4, rtol=1e-4)

    # 3) explicit-state branch (PyTorch `state is not None`), auto mode.
    st0 = jax.random.normal(k6, (B, d_model), dtype=jnp.float32)
    ys, _ = channel_mix(x, params_f32, state=st0)
    ys_ref, _ = channel_mix_ref(x, time_maa_k, time_maa_r, w_key,
                                w_receptance, w_value, state=st0)
    jax.block_until_ready(ys)
    assert jnp.allclose(ys, ys_ref, atol=1e-4, rtol=1e-4)

    # 4) default bf16 matmul operands (MXU-friendly), auto mode: looser tolerance.
    params_bf16 = prepare_channel_mix_params(time_maa_k, time_maa_r, w_key,
                                             w_receptance, w_value)
    y16, s16 = channel_mix(x, params_bf16)
    jax.block_until_ready((y16, s16))
    assert jnp.allclose(y16, y_ref, atol=5e-2, rtol=5e-2)
    assert jnp.allclose(s16, state_ref)

    # 5) bf16 activation streaming option (halves activation DMA / VMEM on v7x).
    y16a = channel_mix(x, params_bf16, act_dtype=jnp.bfloat16, need_state=False)
    jax.block_until_ready(y16a)
    assert jnp.allclose(y16a, y_ref, atol=1e-1, rtol=1e-1)

    print("KERNEL_OK")
</pallas_src>

<mosaic_0001>
module attributes {stable_mosaic.version = 11 : i64} {
  func.func @channel_mix_kernel_fused(%arg0: i32, %arg1: i32, %arg2: memref<8x128xf32, #tpu.memory_space<vmem>>, %arg3: memref<8x128xf32, #tpu.memory_space<vmem>>, %arg4: memref<1x128xf32, #tpu.memory_space<vmem>>, %arg5: memref<1x128xf32, #tpu.memory_space<vmem>>, %arg6: memref<128x128xf32, #tpu.memory_space<vmem>>, %arg7: memref<128x128xf32, #tpu.memory_space<vmem>>, %arg8: memref<128x128xf32, #tpu.memory_space<vmem>>, %arg9: memref<8x128xf32, #tpu.memory_space<vmem>>, %arg10: memref<8x128xf32, #tpu.memory_space<vmem>>, %arg11: memref<8x128xf32, #tpu.memory_space<vmem>>) attributes {dimension_semantics = [#tpu.dimension_semantics<parallel>, #tpu.dimension_semantics<arbitrary>], iteration_bounds = array<i64: 2, 1>, scalar_prefetch = 0 : i64, scratch_operands = 2 : i64, tpu.core_type = #tpu.core_type<tc>, window_params = [{pipeline_mode = #tpu.pipeline_mode<synchronous>, transform_indices = @transform_0, window_bounds = array<i64: 8, 128>}, {pipeline_mode = #tpu.pipeline_mode<synchronous>, transform_indices = @transform_1, window_bounds = array<i64: 8, 128>}, {pipeline_mode = #tpu.pipeline_mode<synchronous>, transform_indices = @transform_2, window_bounds = array<i64: 1, 128>}, {pipeline_mode = #tpu.pipeline_mode<synchronous>, transform_indices = @transform_3, window_bounds = array<i64: 1, 128>}, {transform_indices = @transform_4, window_bounds = array<i64: 128, 128>}, {pipeline_mode = #tpu.pipeline_mode<synchronous>, transform_indices = @transform_5, window_bounds = array<i64: 128, 128>}, {transform_indices = @transform_6, window_bounds = array<i64: 128, 128>}, {transform_indices = @transform_7, window_bounds = array<i64: 8, 128>}]} {
    %c0_i32 = arith.constant 0 : i32
    %0 = arith.cmpi eq, %arg1, %c0_i32 : i32
    %1 = arith.extui %0 : i1 to i32
    %c0_i32_0 = arith.constant 0 : i32
    %2 = arith.cmpi ne, %1, %c0_i32_0 : i32
    scf.if %2 {
      %c0_14 = arith.constant 0 : index
      %c0_15 = arith.constant 0 : index
      %17 = vector.load %arg2[%c0_14, %c0_15] : memref<8x128xf32, #tpu.memory_space<vmem>>, vector<8x128xf32>
      %c0_16 = arith.constant 0 : index
      %c0_17 = arith.constant 0 : index
      %18 = vector.load %arg3[%c0_16, %c0_17] : memref<8x128xf32, #tpu.memory_space<vmem>>, vector<8x128xf32>
      %19 = arith.subf %18, %17 : vector<8x128xf32>
      %c0_18 = arith.constant 0 : index
      %c0_19 = arith.constant 0 : index
      %20 = vector.load %arg4[%c0_18, %c0_19] : memref<1x128xf32, #tpu.memory_space<vmem>>, vector<1x128xf32>
      %21 = vector.broadcast %20 : vector<1x128xf32> to vector<8x128xf32>
      %22 = arith.mulf %19, %21 : vector<8x128xf32>
      %23 = arith.addf %17, %22 : vector<8x128xf32>
      %c0_20 = arith.constant 0 : index
      %c0_21 = arith.constant 0 : index
      %24 = vector.load %arg5[%c0_20, %c0_21] : memref<1x128xf32, #tpu.memory_space<vmem>>, vector<1x128xf32>
      %25 = vector.broadcast %24 : vector<1x128xf32> to vector<8x128xf32>
      %26 = arith.mulf %19, %25 : vector<8x128xf32>
      %27 = arith.addf %17, %26 : vector<8x128xf32>
      %c0_22 = arith.constant 0 : index
      %c0_23 = arith.constant 0 : index
      %28 = vector.load %arg10[%c0_22, %c0_23] : memref<8x128xf32, #tpu.memory_space<vmem>>, vector<8x128xf32>
      tpu.vector_store %arg10[%c0_22, %c0_23], %23 {strides = array<i32>} : memref<8x128xf32, #tpu.memory_space<vmem>>, vector<8x128xf32>,
      %c0_24 = arith.constant 0 : index
      %c0_25 = arith.constant 0 : index
      %29 = vector.load %arg7[%c0_24, %c0_25] : memref<128x128xf32, #tpu.memory_space<vmem>>, vector<128x128xf32>
      %cst_26 = arith.constant dense<0.000000e+00> : vector<8x128xf32>
      %30 = tpu.matmul %27, %29, %cst_26 {dimension_numbers = #tpu.dot_dimension_numbers<[1], [0], [0], [1], [0, 0, 1, 1], [], []>} : vector<8x128xf32>, vector<128x128xf32>, vector<8x128xf32> -> vector<8x128xf32>
      %31 = arith.negf %30 : vector<8x128xf32>
      %32 = math.exp %31 : vector<8x128xf32>
      %cst_27 = arith.constant 1.000000e+00 : f32
      %33 = vector.broadcast %cst_27 : f32 to vector<8x128xf32>
      %34 = arith.addf %33, %32 : vector<8x128xf32>
      %35 = arith.divf %33, %34 : vector<8x128xf32>
      %c0_28 = arith.constant 0 : index
      %c0_29 = arith.constant 0 : index
      %36 = vector.load %arg11[%c0_28, %c0_29] : memref<8x128xf32, #tpu.memory_space<vmem>>, vector<8x128xf32>
      tpu.vector_store %arg11[%c0_28, %c0_29], %35 {strides = array<i32>} : memref<8x128xf32, #tpu.memory_space<vmem>>, vector<8x128xf32>,
      %cst_30 = arith.constant 0.000000e+00 : f32
      %37 = vector.broadcast %cst_30 : f32 to vector<8x128xf32>
      %c0_31 = arith.constant 0 : index
      %c0_32 = arith.constant 0 : index
      %38 = vector.load %arg9[%c0_31, %c0_32] : memref<8x128xf32, #tpu.memory_space<vmem>>, vector<8x128xf32>
      tpu.vector_store %arg9[%c0_31, %c0_32], %37 {strides = array<i32>} : memref<8x128xf32, #tpu.memory_space<vmem>>, vector<8x128xf32>,
    } else {
    }
    %c0 = arith.constant 0 : index
    %c0_1 = arith.constant 0 : index
    %3 = vector.load %arg10[%c0, %c0_1] : memref<8x128xf32, #tpu.memory_space<vmem>>, vector<8x128xf32>
    %c0_2 = arith.constant 0 : index
    %c0_3 = arith.constant 0 : index
    %4 = vector.load %arg6[%c0_2, %c0_3] : memref<128x128xf32, #tpu.memory_space<vmem>>, vector<128x128xf32>
    %cst = arith.constant dense<0.000000e+00> : vector<8x128xf32>
    %5 = tpu.matmul %3, %4, %cst {dimension_numbers = #tpu.dot_dimension_numbers<[1], [0], [0], [1], [0, 0, 1, 1], [], []>} : vector<8x128xf32>, vector<128x128xf32>, vector<8x128xf32> -> vector<8x128xf32>
    %cst_4 = arith.constant 0.000000e+00 : f32
    %6 = vector.broadcast %cst_4 : f32 to vector<8x128xf32>
    %7 = arith.maximumf %5, %6 : vector<8x128xf32>
    %8 = arith.mulf %7, %7 : vector<8x128xf32>
    %c0_5 = arith.constant 0 : index
    %c0_6 = arith.constant 0 : index
    %9 = vector.load %arg9[%c0_5, %c0_6] : memref<8x128xf32, #tpu.memory_space<vmem>>, vector<8x128xf32>
    %c0_7 = arith.constant 0 : index
    %c0_8 = arith.constant 0 : index
    %10 = vector.load %arg8[%c0_7, %c0_8] : memref<128x128xf32, #tpu.memory_space<vmem>>, vector<128x128xf32>
    %cst_9 = arith.constant dense<0.000000e+00> : vector<8x128xf32>
    %11 = tpu.matmul %8, %10, %cst_9 {dimension_numbers = #tpu.dot_dimension_numbers<[1], [0], [0], [1], [0, 0, 1, 1], [], []>} : vector<8x128xf32>, vector<128x128xf32>, vector<8x128xf32> -> vector<8x128xf32>
    %12 = arith.addf %9, %11 : vector<8x128xf32>
    %c0_10 = arith.constant 0 : index
    %c0_11 = arith.constant 0 : index
    %13 = vector.load %arg9[%c0_10, %c0_11] : memref<8x128xf32, #tpu.memory_space<vmem>>, vector<8x128xf32>
    tpu.vector_store %arg9[%c0_10, %c0_11], %12 {strides = array<i32>} : memref<8x128xf32, #tpu.memory_space<vmem>>, vector<8x128xf32>,
    %c0_i32_12 = arith.constant 0 : i32
    %14 = arith.cmpi eq, %arg1, %c0_i32_12 : i32
    %15 = arith.extui %14 : i1 to i32
    %c0_i32_13 = arith.constant 0 : i32
    %16 = arith.cmpi ne, %15, %c0_i32_13 : i32
    scf.if %16 {
      %c0_14 = arith.constant 0 : index
      %c0_15 = arith.constant 0 : index
      %17 = vector.load %arg11[%c0_14, %c0_15] : memref<8x128xf32, #tpu.memory_space<vmem>>, vector<8x128xf32>
      %c0_16 = arith.constant 0 : index
      %c0_17 = arith.constant 0 : index
      %18 = vector.load %arg9[%c0_16, %c0_17] : memref<8x128xf32, #tpu.memory_space<vmem>>, vector<8x128xf32>
      %19 = arith.mulf %17, %18 : vector<8x128xf32>
      %c0_18 = arith.constant 0 : index
      %c0_19 = arith.constant 0 : index
      %20 = vector.load %arg9[%c0_18, %c0_19] : memref<8x128xf32, #tpu.memory_space<vmem>>, vector<8x128xf32>
      tpu.vector_store %arg9[%c0_18, %c0_19], %19 {strides = array<i32>} : memref<8x128xf32, #tpu.memory_space<vmem>>, vector<8x128xf32>,
    } else {
    }
    return
  }
  func.func @transform_0(%arg0: i32, %arg1: i32) -> (i32, i32) {
    %c0_i32 = arith.constant 0 : i32
    %c0_i32_0 = arith.constant 0 : i32
    return %arg0, %c0_i32 : i32, i32
  }
  func.func @transform_1(%arg0: i32, %arg1: i32) -> (i32, i32) {
    %c0_i32 = arith.constant 0 : i32
    %c0_i32_0 = arith.constant 0 : i32
    return %arg0, %c0_i32 : i32, i32
  }
  func.func @transform_2(%arg0: i32, %arg1: i32) -> (i32, i32) {
    %c0_i32 = arith.constant 0 : i32
    %c0_i32_0 = arith.constant 0 : i32
    %c0_i32_1 = arith.constant 0 : i32
    return %c0_i32, %c0_i32_0 : i32, i32
  }
  func.func @transform_3(%arg0: i32, %arg1: i32) -> (i32, i32) {
    %c0_i32 = arith.constant 0 : i32
    %c0_i32_0 = arith.constant 0 : i32
    %c0_i32_1 = arith.constant 0 : i32
    return %c0_i32, %c0_i32_0 : i32, i32
  }
  func.func @transform_4(%arg0: i32, %arg1: i32) -> (i32, i32) {
    %c0_i32 = arith.constant 0 : i32
    %c0_i32_0 = arith.constant 0 : i32
    return %c0_i32, %arg1 : i32, i32
  }
  func.func @transform_5(%arg0: i32, %arg1: i32) -> (i32, i32) {
    %c0_i32 = arith.constant 0 : i32
    %c0_i32_0 = arith.constant 0 : i32
    %c0_i32_1 = arith.constant 0 : i32
    return %c0_i32, %c0_i32_0 : i32, i32
  }
  func.func @transform_6(%arg0: i32, %arg1: i32) -> (i32, i32) {
    %c0_i32 = arith.constant 0 : i32
    %c0_i32_0 = arith.constant 0 : i32
    return %arg1, %c0_i32 : i32, i32
  }
  func.func @transform_7(%arg0: i32, %arg1: i32) -> (i32, i32) {
    %c0_i32 = arith.constant 0 : i32
    %c0_i32_0 = arith.constant 0 : i32
    return %arg0, %c0_i32 : i32, i32
  }
}

module attributes {stable_mosaic.version = 11 : i64} {
  func.func @channel_mix_kernel_fused(%arg0: i32, %arg1: i32, %arg2: memref<8x128xf32, #tpu.memory_space<vmem>>, %arg3: memref<8x128xf32, #tpu.memory_space<vmem>>, %arg4: memref<1x128xf32, #tpu.memory_space<vmem>>, %arg5: memref<1x128xf32, #tpu.memory_space<vmem>>, %arg6: memref<128x128xf32, #tpu.memory_space<vmem>>, %arg7: memref<128x128xf32, #tpu.memory_space<vmem>>, %arg8: memref<128x128xf32, #tpu.memory_space<vmem>>, %arg9: memref<8x128xf32, #tpu.memory_space<vmem>>, %arg10: memref<8x128xf32, #tpu.memory_space<vmem>>, %arg11: memref<8x128xf32, #tpu.memory_space<vmem>>) attributes {dimension_semantics = [#tpu.dimension_semantics<parallel>, #tpu.dimension_semantics<arbitrary>], iteration_bounds = array<i64: 2, 1>, scalar_prefetch = 0 : i64, scratch_operands = 2 : i64, tpu.core_type = #tpu.core_type<tc>, window_params = [{transform_indices = @transform_0, window_bounds = array<i64: 8, 128>}, {transform_indices = @transform_1, window_bounds = array<i64: 8, 128>}, {pipeline_mode = #tpu.pipeline_mode<synchronous>, transform_indices = @transform_2, window_bounds = array<i64: 1, 128>}, {pipeline_mode = #tpu.pipeline_mode<synchronous>, transform_indices = @transform_3, window_bounds = array<i64: 1, 128>}, {transform_indices = @transform_4, window_bounds = array<i64: 128, 128>}, {pipeline_mode = #tpu.pipeline_mode<synchronous>, transform_indices = @transform_5, window_bounds = array<i64: 128, 128>}, {transform_indices = @transform_6, window_bounds = array<i64: 128, 128>}, {transform_indices = @transform_7, window_bounds = array<i64: 8, 128>}]} {
    %c0_i32 = arith.constant 0 : i32
    %0 = arith.cmpi eq, %arg1, %c0_i32 : i32
    %1 = arith.extui %0 : i1 to i32
    %c0_i32_0 = arith.constant 0 : i32
    %2 = arith.cmpi ne, %1, %c0_i32_0 : i32
    scf.if %2 {
      %c0_14 = arith.constant 0 : index
      %c0_15 = arith.constant 0 : index
      %17 = vector.load %arg2[%c0_14, %c0_15] : memref<8x128xf32, #tpu.memory_space<vmem>>, vector<8x128xf32>
      %c0_16 = arith.constant 0 : index
      %c0_17 = arith.constant 0 : index
      %18 = vector.load %arg3[%c0_16, %c0_17] : memref<8x128xf32, #tpu.memory_space<vmem>>, vector<8x128xf32>
      %19 = arith.subf %18, %17 : vector<8x128xf32>
      %c0_18 = arith.constant 0 : index
      %c0_19 = arith.constant 0 : index
      %20 = vector.load %arg4[%c0_18, %c0_19] : memref<1x128xf32, #tpu.memory_space<vmem>>, vector<1x128xf32>
      %21 = vector.broadcast %20 : vector<1x128xf32> to vector<8x128xf32>
      %22 = arith.mulf %19, %21 : vector<8x128xf32>
      %23 = arith.addf %17, %22 : vector<8x128xf32>
      %c0_20 = arith.constant 0 : index
      %c0_21 = arith.constant 0 : index
      %24 = vector.load %arg5[%c0_20, %c0_21] : memref<1x128xf32, #tpu.memory_space<vmem>>, vector<1x128xf32>
      %25 = vector.broadcast %24 : vector<1x128xf32> to vector<8x128xf32>
      %26 = arith.mulf %19, %25 : vector<8x128xf32>
      %27 = arith.addf %17, %26 : vector<8x128xf32>
      %c0_22 = arith.constant 0 : index
      %c0_23 = arith.constant 0 : index
      %28 = vector.load %arg10[%c0_22, %c0_23] : memref<8x128xf32, #tpu.memory_space<vmem>>, vector<8x128xf32>
      tpu.vector_store %arg10[%c0_22, %c0_23], %23 {strides = array<i32>} : memref<8x128xf32, #tpu.memory_space<vmem>>, vector<8x128xf32>,
      %c0_24 = arith.constant 0 : index
      %c0_25 = arith.constant 0 : index
      %29 = vector.load %arg7[%c0_24, %c0_25] : memref<128x128xf32, #tpu.memory_space<vmem>>, vector<128x128xf32>
      %cst_26 = arith.constant dense<0.000000e+00> : vector<8x128xf32>
      %30 = tpu.matmul %27, %29, %cst_26 {dimension_numbers = #tpu.dot_dimension_numbers<[1], [0], [0], [1], [0, 0, 1, 1], [], []>} : vector<8x128xf32>, vector<128x128xf32>, vector<8x128xf32> -> vector<8x128xf32>
      %31 = arith.negf %30 : vector<8x128xf32>
      %32 = math.exp %31 : vector<8x128xf32>
      %cst_27 = arith.constant 1.000000e+00 : f32
      %33 = vector.broadcast %cst_27 : f32 to vector<8x128xf32>
      %34 = arith.addf %33, %32 : vector<8x128xf32>
      %35 = arith.divf %33, %34 : vector<8x128xf32>
      %c0_28 = arith.constant 0 : index
      %c0_29 = arith.constant 0 : index
      %36 = vector.load %arg11[%c0_28, %c0_29] : memref<8x128xf32, #tpu.memory_space<vmem>>, vector<8x128xf32>
      tpu.vector_store %arg11[%c0_28, %c0_29], %35 {strides = array<i32>} : memref<8x128xf32, #tpu.memory_space<vmem>>, vector<8x128xf32>,
      %cst_30 = arith.constant 0.000000e+00 : f32
      %37 = vector.broadcast %cst_30 : f32 to vector<8x128xf32>
      %c0_31 = arith.constant 0 : index
      %c0_32 = arith.constant 0 : index
      %38 = vector.load %arg9[%c0_31, %c0_32] : memref<8x128xf32, #tpu.memory_space<vmem>>, vector<8x128xf32>
      tpu.vector_store %arg9[%c0_31, %c0_32], %37 {strides = array<i32>} : memref<8x128xf32, #tpu.memory_space<vmem>>, vector<8x128xf32>,
    } else {
    }
    %c0 = arith.constant 0 : index
    %c0_1 = arith.constant 0 : index
    %3 = vector.load %arg10[%c0, %c0_1] : memref<8x128xf32, #tpu.memory_space<vmem>>, vector<8x128xf32>
    %c0_2 = arith.constant 0 : index
    %c0_3 = arith.constant 0 : index
    %4 = vector.load %arg6[%c0_2, %c0_3] : memref<128x128xf32, #tpu.memory_space<vmem>>, vector<128x128xf32>
    %cst = arith.constant dense<0.000000e+00> : vector<8x128xf32>
    %5 = tpu.matmul %3, %4, %cst {dimension_numbers = #tpu.dot_dimension_numbers<[1], [0], [0], [1], [0, 0, 1, 1], [], []>} : vector<8x128xf32>, vector<128x128xf32>, vector<8x128xf32> -> vector<8x128xf32>
    %cst_4 = arith.constant 0.000000e+00 : f32
    %6 = vector.broadcast %cst_4 : f32 to vector<8x128xf32>
    %7 = arith.maximumf %5, %6 : vector<8x128xf32>
    %8 = arith.mulf %7, %7 : vector<8x128xf32>
    %c0_5 = arith.constant 0 : index
    %c0_6 = arith.constant 0 : index
    %9 = vector.load %arg9[%c0_5, %c0_6] : memref<8x128xf32, #tpu.memory_space<vmem>>, vector<8x128xf32>
    %c0_7 = arith.constant 0 : index
    %c0_8 = arith.constant 0 : index
    %10 = vector.load %arg8[%c0_7, %c0_8] : memref<128x128xf32, #tpu.memory_space<vmem>>, vector<128x128xf32>
    %cst_9 = arith.constant dense<0.000000e+00> : vector<8x128xf32>
    %11 = tpu.matmul %8, %10, %cst_9 {dimension_numbers = #tpu.dot_dimension_numbers<[1], [0], [0], [1], [0, 0, 1, 1], [], []>} : vector<8x128xf32>, vector<128x128xf32>, vector<8x128xf32> -> vector<8x128xf32>
    %12 = arith.addf %9, %11 : vector<8x128xf32>
    %c0_10 = arith.constant 0 : index
    %c0_11 = arith.constant 0 : index
    %13 = vector.load %arg9[%c0_10, %c0_11] : memref<8x128xf32, #tpu.memory_space<vmem>>, vector<8x128xf32>
    tpu.vector_store %arg9[%c0_10, %c0_11], %12 {strides = array<i32>} : memref<8x128xf32, #tpu.memory_space<vmem>>, vector<8x128xf32>,
    %c0_i32_12 = arith.constant 0 : i32
    %14 = arith.cmpi eq, %arg1, %c0_i32_12 : i32
    %15 = arith.extui %14 : i1 to i32
    %c0_i32_13 = arith.constant 0 : i32
    %16 = arith.cmpi ne, %15, %c0_i32_13 : i32
    scf.if %16 {
      %c0_14 = arith.constant 0 : index
      %c0_15 = arith.constant 0 : index
      %17 = vector.load %arg11[%c0_14, %c0_15] : memref<8x128xf32, #tpu.memory_space<vmem>>, vector<8x128xf32>
      %c0_16 = arith.constant 0 : index
      %c0_17 = arith.constant 0 : index
      %18 = vector.load %arg9[%c0_16, %c0_17] : memref<8x128xf32, #tpu.memory_space<vmem>>, vector<8x128xf32>
      %19 = arith.mulf %17, %18 : vector<8x128xf32>
      %c0_18 = arith.constant 0 : index
      %c0_19 = arith.constant 0 : index
      %20 = vector.load %arg9[%c0_18, %c0_19] : memref<8x128xf32, #tpu.memory_space<vmem>>, vector<8x128xf32>
      tpu.vector_store %arg9[%c0_18, %c0_19], %19 {strides = array<i32>} : memref<8x128xf32, #tpu.memory_space<vmem>>, vector<8x128xf32>,
    } else {
    }
    return
  }
  func.func @transform_0(%arg0: i32, %arg1: i32) -> (i32, i32) {
    %c0_i32 = arith.constant 0 : i32
    %c0_i32_0 = arith.constant 0 : i32
    return %arg0, %c0_i32 : i32, i32
  }
  func.func @transform_1(%arg0: i32, %arg1: i32) -> (i32, i32) {
    %c0_i32 = arith.constant 0 : i32
    %c0_i32_0 = arith.constant 0 : i32
    return %arg0, %c0_i32 : i32, i32
  }
  func.func @transform_2(%arg0: i32, %arg1: i32) -> (i32, i32) {
    %c0_i32 = arith.constant 0 : i32
    %c0_i32_0 = arith.constant 0 : i32
    %c0_i32_1 = arith.constant 0 : i32
    return %c0_i32, %c0_i32_0 : i32, i32
  }
  func.func @transform_3(%arg0: i32, %arg1: i32) -> (i32, i32) {
    %c0_i32 = arith.constant 0 : i32
    %c0_i32_0 = arith.constant 0 : i32
    %c0_i32_1 = arith.constant 0 : i32
    return %c0_i32, %c0_i32_0 : i32, i32
  }
  func.func @transform_4(%arg0: i32, %arg1: i32) -> (i32, i32) {
    %c0_i32 = arith.constant 0 : i32
    %c0_i32_0 = arith.constant 0 : i32
    return %c0_i32, %arg1 : i32, i32
  }
  func.func @transform_5(%arg0: i32, %arg1: i32) -> (i32, i32) {
    %c0_i32 = arith.constant 0 : i32
    %c0_i32_0 = arith.constant 0 : i32
    %c0_i32_1 = arith.constant 0 : i32
    return %c0_i32, %c0_i32_0 : i32, i32
  }
  func.func @transform_6(%arg0: i32, %arg1: i32) -> (i32, i32) {
    %c0_i32 = arith.constant 0 : i32
    %c0_i32_0 = arith.constant 0 : i32
    return %arg1, %c0_i32 : i32, i32
  }
  func.func @transform_7(%arg0: i32, %arg1: i32) -> (i32, i32) {
    %c0_i32 = arith.constant 0 : i32
    %c0_i32_0 = arith.constant 0 : i32
    return %arg0, %c0_i32 : i32, i32
  }
}

</mosaic_0001>

<bundles_post_ra>
// kernel: tpu_custom_call.1
= control target key start
LH: loop header
LB: loop body
LE: loop exit
PB: predicated region body
PF: predicated region fallthrough
CT: control target
= control target key end

     0   :  { %s1763_s0 = inlined_call_operand.hbm [shape: f32[16,128], index: 0, kind: input, shape index: {}]   ;;  %s1764_s1 = inlined_call_operand.hbm [shape: f32[16,128], index: 1, kind: input, shape index: {}]   ;;  %s1765_s2 = inlined_call_operand.vmem [shape: f32[1,128], index: 2, kind: input, shape index: {}]   ;;  %s1766_s3 = inlined_call_operand.vmem [shape: f32[1,128], index: 3, kind: input, shape index: {}]   ;;  %s1767_s4 = inlined_call_operand.hbm [shape: f32[128,128], index: 4, kind: input, shape index: {}]   ;;  %s1768_s5 = inlined_call_operand.hbm [shape: f32[128,128], index: 5, kind: input, shape index: {}]   ;;  %s1769_s6 = inlined_call_operand.hbm [shape: f32[128,128], index: 6, kind: input, shape index: {}]   ;;  %s1770_s7 = inlined_call_operand.hbm [shape: f32[16,128], index: 7, kind: output, shape index: {}]  }
   0x1   :  { %1792 = sst [smem:[#allocation26_spill]] %s1764_s1 }
   0x2   :  { %1793 = sst [smem:[#allocation27_spill]] %s1770_s7 }
   0x3   :  { %12 = vsyncpa [#allocation5], 0 }
   0x4   :  { %13 = vsyncpa [#allocation8], 0 }
   0x5   :  { %14 = vsyncpa [#allocation11], 0 }
   0x6   :  { %15 = vsyncpa [#allocation6], 0 }
   0x7   :  { %17 = vsyncpa [#allocation6 + $0x1], 0  ;;  %s1446_s24 = smov 0   ;;  %s1448_s25 = smov 0  }
   0x8   :  { %s1450_s26 = smov 0   ;;  %s1452_s27 = smov 0  }
   0x9   :  { %s1454_s28 = smov 0   ;;  %s1456_s29 = smov 0  }
   0xa LB: > { %1794 = sst [smem:[#allocation19_spill]] %s1373_s24  ;;  %s800_s30 = sadd.s32 4294967295, %s1393_s29   ;;  %s1393_s29 = sphi %s1456_s29, %s23_s29   ;;  %s1389_s28 = sphi %s1454_s28, %s1828_s28   ;;  %s1385_s27 = sphi %s1452_s27, %s1827_s27   ;;  %s1381_s26 = sphi %s1450_s26, %s1826_s26   ;;  %s1377_s25 = sphi %s1448_s25, %s1830_s25   ;;  %s1373_s24 = sphi %s1446_s24, %s1829_s24  }
   0xb   : > { %1795 = sst [smem:[#allocation20_spill]] %s1381_s26  ;;  %s801_s8 = sadd.s32 4294967294, %s1393_s29  }
   0xc   : > { %1796 = sst [smem:[#allocation21_spill]] %s1389_s28  ;;  %s35_s9 = sadd.s32 1, %s1389_s28 }
   0xd   : > { %1797 = sst [smem:[#allocation22_spill]] %s1393_s29  ;;  %s42_s10 = sadd.s32 1, %s1381_s26 }
   0xe   : > { %p37_p0 = scmp.ge.s32.totalorder %s35_s9, 2  ;;  %p55_p1 = scmp.ne.s32.totalorder %s1377_s25, %s1373_s24 }
   0xf   : > { %p1480_p2 = scmp.eq.s32.totalorder %s800_s30, 0  ;;  %p219_p3 = scmp.ne.s32.totalorder %s1381_s26, %s1377_s25 }
  0x10   : > { %s1832_s9 = smov (%p37_p0, %s35_s9), 0  ;;  %p220_p5 = scmp.eq.s32.totalorder %s800_s30, 1 }
  0x11   : > { %s1798_s11 = scalar_select %p1480_p2, 1, 0 }
  0x12   : > { %1799 = sst [smem:[#allocation23_spill]] %s1832_s9  ;;  %p1490_p4 = por %p1480_p2, %p55_p1 }
  0x13   : > { %s39_s13 = ssub.s32 %s1389_s28, %s1832_s9  ;;  %p226_p6 = scmp.eq.s32.totalorder %s801_s8, 1 }
  0x14   : > { %s1800_s12 = scalar_select %p1490_p4, 1, 0 }
  0x15   : > { %p40_p7 = scmp.eq.s32.totalorder %s39_s13, 0  ;;  %p1496_p8 = por %p220_p5, %p219_p3 }
  0x16   : > { %p1500_p9 = por %p226_p6, %p55_p1  ;;  %p802_p10 = scmp.ge.s32.totalorder %s1393_s29, 1 }
  0x17   : > { %s1801_s14 = scalar_select %p1496_p8, 1, 0 }
  0x18   : > { %s1802_s15 = scalar_select %p1500_p9, 1, 0 }
  0x19   : > { %s1506_s16 = scalar_select %p40_p7, %s1381_s26, %s42_s10  }
  0x1a   : > { %1803 = sst [smem:[#allocation24_spill]] %s1802_s15  ;;  %p233_p11 = scmp.lt.s32.totalorder %s1393_s29, 3 }
  0x1b   : > { %1804 = sst [smem:[#allocation25_spill]] %s1506_s16  ;;  %s1509_s17 = sshll.u32 %s1385_s27, 7 }
  0x1c   : > { %s1805_s1 = sld [smem:[#allocation26_spill]]  ;;  %p1517_p12 = pnand %p802_p10, %p233_p11 }
  0x1d   : > { %s1395_s22 = smov [#allocation7]   ;;  %s1396_s8 = smov [#allocation10]  }
  0x1e   : > { %s1806_s21 = scalar_select %p1517_p12, 1, 0 }
  0x1f   : > { %s261_s23 = sshll.u32 %s1395_s22, 4  ;;  %p1066_p13 = pneg %p1517_p12  ;;  %s1521_s23 = int_to_ptr.vmem [resolvable:$true] %s261_s23 }
  0x20   : > { %s292_s10 = sshll.u32 %s1396_s8, 4  ;;  %s1541_s19 = scalar_lea.hbm %s1763_s0, %s1509_s17  ;;  %s293_s10 = int_to_ptr.vmem [resolvable:$true] %s292_s10 }
  0x21   : > { %p1527_p0 = pnand %p1066_p13, %p1490_p4  ;;  %p1533_p1 = pnand %p1066_p13, %p1480_p2 }
  0x22   : > { %s1515_s20 = scalar_lea.hbm %s1805_s1, %s1509_s17  ;;  %s1160_s16 = scalar_lea.hbm %s1805_s1, 256 }
  0x23   : > { %s1807_s27 = scalar_select %p1527_p0, 1, 0 }
  0x24   : > { %s1808_s30 = scalar_select %p1533_p1, 1, 0 }
  0x25   : > { %s1155_s22 = scalar_lea.hbm %s1515_s20, 128  ;;  %p1782_p5 = pneg %p1527_p0 }
  0x26   : > { %p1156_p3 = scmp.ne.s32.totalorder %s1515_s20, %s1155_s22  ;;  %p1161_p10 = scmp.lt.u32.totalorder %s1515_s20, %s1805_s1 }
  0x27   : > { %p1162_p11 = scmp.lt.u32.totalorder %s1160_s16, %s1155_s22  ;;  %p1164_p9 = scmp.lt.u32.totalorder %s1155_s22, %s1515_s20 }
  0x28   : > { %p1158_p6 = pnand %p1782_p5, %p1156_p3 }
  0x29   : > { %p1163_p13 = por %p1162_p11, %p1161_p10 }
  0x2a   : > { %p1159_p7 = pneg %p1158_p6 }
  0x2b   : > { %p1165_p8 = por %p1164_p9, %p1163_p13 }
  0x2d   : > { %p1166_p2 = pnand %p1165_p8, %p1159_p7 }
  0x2f   : > { %1169 = shalt.err (!%p1166_p2)
}
  0x30   : > { %s1170_s8 = scalar_lea.vmem %s1521_s23, 128  ;;  %p1178_p12 = scmp.lt.s32.totalorder %s1521_s23, %s1521_s23 }
  0x31   : > { %p1171_p3 = scmp.ne.s32.totalorder %s1521_s23, %s1170_s8  ;;  %p1179_p1 = scmp.lt.s32.totalorder %s1170_s8, %s1170_s8 }
  0x33   : > { %p1173_p6 = pnand %p1171_p3, %p1782_p5  ;;  %p1180_p10 = por %p1179_p1, %p1178_p12 }
  0x35   : > { %p1174_p4 = pneg %p1173_p6 }
  0x37   : > { %p1181_p11 = pnand %p1180_p10, %p1174_p4 }
  0x39   : > { %1184 = shalt.err (!%p1181_p11)
}
  0x3a   : > { %1072 = dma.hbm_to_vmem [thread:$0]  (!%p1527_p0), %s1515_s20, 128, %s1521_s23, [#allocation8]  }
  0x3b   : > { %s1185_s9 = scalar_lea.hbm %s1768_s5, 2048  ;;  %p1809_p8 = scmp.ne.s32.totalorder %s1808_s30, 0 }
  0x3c   : > { %p1186_p2 = scmp.ne.s32.totalorder %s1768_s5, %s1185_s9  ;;  %p1192_p1 = scmp.lt.u32.totalorder %s1185_s9, %s1768_s5 }
  0x3d   : > { %p1577_p9 = pneg %p1809_p8 }
  0x3f   : > { %s1810_s13 = scalar_select %p1577_p9, 1, 0 }
  0x40   : > { %p1188_p4 = pnand %p1577_p9, %p1186_p2 }
  0x42   : > { %p1189_p12 = pneg %p1188_p4 }
  0x44   : > { %p1194_p7 = pnand %p1192_p1, %p1189_p12 }
  0x46   : > { %1197 = shalt.err (!%p1194_p7)
}
  0x47   : > { %s1198_s23 = scalar_lea.vmem %s293_s10, 2048  ;;  %p1206_p10 = scmp.lt.s32.totalorder %s293_s10, %s293_s10 }
  0x48   : > { %p1199_p13 = scmp.ne.s32.totalorder %s293_s10, %s1198_s23  ;;  %p1207_p11 = scmp.lt.s32.totalorder %s1198_s23, %s1198_s23 }
  0x4a   : > { %p1201_p3 = pnand %p1199_p13, %p1577_p9  ;;  %p1208_p5 = por %p1207_p11, %p1206_p10 }
  0x4c   : > { %p1202_p6 = pneg %p1201_p3 }
  0x4e   : > { %p1209_p0 = pnand %p1208_p5, %p1202_p6 }
  0x50   : > { %1212 = shalt.err (!%p1209_p0)
}
  0x51   : > { %s1397_s22 = smov 128   ;;  %s1398_s8 = smov 8  }
  0x52   : > { %1078 = dma.hbm_to_vmem [thread:$0]  (!%p1809_p8), %s1768_s5, 2048, %s293_s10, [#allocation11], %s1397_s22, %s1397_s22, %s1398_s8  }
  0x53   : > { %s1399_s9 = smov [#allocation4]   ;;  %s1400_s16 = smov [#allocation9]  }
  0x54   : > { %s248_s15 = sshll.u32 %s1399_s9, 4  ;;  %s279_s18 = sshll.u32 %s1400_s16, 4  ;;  %s249_s15 = int_to_ptr.vmem [resolvable:$true] %s248_s15  ;;  %s280_s18 = int_to_ptr.vmem [resolvable:$true] %s279_s18 }
  0x55   : > { %s1213_s20 = scalar_lea.hbm %s1541_s19, 128  ;;  %p1811_p5 = scmp.ne.s32.totalorder %s1807_s27, 0 }
  0x56   : > { %p1214_p0 = scmp.ne.s32.totalorder %s1541_s19, %s1213_s20  ;;  %s1218_s24 = scalar_lea.hbm %s1763_s0, 256 }
  0x57   : > { %p1812_p2 = pneg %p1811_p5  ;;  %p1219_p1 = scmp.lt.u32.totalorder %s1541_s19, %s1763_s0 }
  0x58   : > { %p1220_p7 = scmp.lt.u32.totalorder %s1218_s24, %s1213_s20  ;;  %p1222_p3 = scmp.lt.u32.totalorder %s1213_s20, %s1541_s19 }
  0x59   : > { %p1216_p4 = pnand %p1214_p0, %p1812_p2 }
  0x5a   : > { %p1221_p13 = por %p1220_p7, %p1219_p1 }
  0x5b   : > { %p1217_p12 = pneg %p1216_p4 }
  0x5c   : > { %p1223_p6 = por %p1222_p3, %p1221_p13 }
  0x5e   : > { %p1224_p10 = pnand %p1223_p6, %p1217_p12 }
  0x60   : > { %1227 = shalt.err (!%p1224_p10)
}
  0x61   : > { %s1228_s10 = scalar_lea.vmem %s249_s15, 128  ;;  %p1813_p0 = pmov %p1812_p2 }
  0x62   : > { %p1229_p11 = scmp.ne.s32.totalorder %s249_s15, %s1228_s10  ;;  %p1236_p8 = scmp.lt.s32.totalorder %s249_s15, %s249_s15 }
  0x63   : > { %p1237_p9 = scmp.lt.s32.totalorder %s1228_s10, %s1228_s10 }
  0x64   : > { %p1231_p2 = pnand %p1229_p11, %p1813_p0 }
  0x65   : > { %p1238_p1 = por %p1237_p9, %p1236_p8 }
  0x66   : > { %p1232_p4 = pneg %p1231_p2 }
  0x68   : > { %p1239_p7 = pnand %p1238_p1, %p1232_p4 }
  0x6a   : > { %1242 = shalt.err (!%p1239_p7)
}
  0x6b   : > { %1069 = dma.hbm_to_vmem [thread:$0]  (!%p1811_p5), %s1541_s19, 128, %s249_s15, [#allocation5]  }
  0x6c   : > { %s1243_s24 = scalar_lea.hbm %s1767_s4, 2048  ;;  %p1814_p13 = scmp.ne.s32.totalorder %s1810_s13, 0 }
  0x6d   : > { %p1244_p12 = scmp.ne.s32.totalorder %s1767_s4, %s1243_s24  ;;  %p1250_p8 = scmp.lt.u32.totalorder %s1243_s24, %s1767_s4 }
  0x6f   : > { %p1246_p3 = pnand %p1244_p12, %p1814_p13 }
  0x71   : > { %p1247_p6 = pneg %p1246_p3 }
  0x73   : > { %p1252_p9 = pnand %p1250_p8, %p1247_p6 }
  0x75   : > { %1255 = shalt.err (!%p1252_p9)
}
  0x76   : > { %s1256_s27 = scalar_lea.vmem %s280_s18, 2048  ;;  %p1264_p0 = scmp.lt.s32.totalorder %s280_s18, %s280_s18 }
  0x77   : > { %p1257_p5 = scmp.ne.s32.totalorder %s280_s18, %s1256_s27  ;;  %p1265_p2 = scmp.lt.s32.totalorder %s1256_s27, %s1256_s27 }
  0x79   : > { %p1259_p10 = pnand %p1257_p5, %p1814_p13  ;;  %p1266_p4 = por %p1265_p2, %p1264_p0 }
  0x7b   : > { %p1260_p11 = pneg %p1259_p10 }
  0x7d   : > { %p1267_p1 = pnand %p1266_p4, %p1260_p11 }
  0x7f   : > { %1270 = shalt.err (!%p1267_p1)
}
  0x80   : > { %p1815_p7 = scmp.ne.s32.totalorder %s1808_s30, 0  ;;  %s1401_s16 = smov [#allocation12]  }
  0x81   : > { %s308_s20 = sshll.u32 %s1401_s16, 4  ;;  %s1271_s1 = scalar_lea.hbm %s1769_s6, 2048  ;;  %s309_s20 = int_to_ptr.vmem [resolvable:$true] %s308_s20 }
  0x82   : > { %1075 = dma.hbm_to_vmem [thread:$0]  (!%p1815_p7), %s1767_s4, 2048, %s280_s18, [#allocation8], %s1397_s22, %s1397_s22, %s1398_s8  }
  0x83   : > { %p1272_p12 = scmp.ne.s32.totalorder %s1769_s6, %s1271_s1  ;;  %p1278_p8 = scmp.lt.u32.totalorder %s1271_s1, %s1769_s6 }
  0x85   : > { %p1274_p3 = pnand %p1272_p12, %p1814_p13 }
  0x87   : > { %p1275_p6 = pneg %p1274_p3 }
  0x89   : > { %p1280_p9 = pnand %p1278_p8, %p1275_p6 }
  0x8b   : > { %1283 = shalt.err (!%p1280_p9)
}
  0x8c   : > { %s1284_s18 = scalar_lea.vmem %s309_s20, 2048  ;;  %p1292_p0 = scmp.lt.s32.totalorder %s309_s20, %s309_s20 }
  0x8d   : > { %p1285_p5 = scmp.ne.s32.totalorder %s309_s20, %s1284_s18  ;;  %p1293_p2 = scmp.lt.s32.totalorder %s1284_s18, %s1284_s18 }
  0x8f   : > { %p1287_p10 = pnand %p1285_p5, %p1814_p13  ;;  %p1294_p4 = por %p1293_p2, %p1292_p0 }
  0x91   : > { %p1288_p11 = pneg %p1287_p10 }
  0x93   : > { %p1295_p1 = pnand %p1294_p4, %p1288_p11 }
  0x95   : > { %1298 = shalt.err (!%p1295_p1)
}
  0x96   : > { %1081 = dma.hbm_to_vmem [thread:$0]  (!%p1815_p7), %s1769_s6, 2048, %s309_s20, [#allocation11], %s1397_s22, %s1397_s22, %s1398_s8  }
  0x97   : > { %p1816_p12 = scmp.ne.s32.totalorder %s1806_s21, 0 }
  0x98   : > { %p1817_p13 = scmp.ne.s32.totalorder (!%p1816_p12), %s1800_s12, 0 }
  0x99   : > { %324 = sbr.rel (%p1816_p12) target bundleno = 647 (0x287), region = 48 }
  0xa0   : > { %1352 = dma.done.wait (%p1817_p13), [#allocation5], 128  }
  0xa1   : > { %1354 = vsyncadd (%p1817_p13), [#allocation5], 4294967168 }
  0xa2   : > { %1356 = dma.done.wait (%p1817_p13), [#allocation8], 128  }
  0xa3   : > { %1358 = vsyncadd (%p1817_p13), [#allocation8], 4294967168  ;;  %p1818_p3 = scmp.ne.s32.totalorder %s1798_s11, 0 }
  0xa5   : > { %1360 = dma.done.wait (%p1818_p3), [#allocation8], 2048  }
  0xa6   : > { %1362 = vsyncadd (%p1818_p3), [#allocation8], 4294965248 }
  0xa7   : > { %1364 = dma.done.wait (%p1818_p3), [#allocation11], 4096  }
  0xa8   : > { %1366 = vsyncadd (%p1818_p3), [#allocation11], 4294963200  ;;  %v1402_v0 = vmov 0.0|0.0   ;;  %vm1403_vm0 = vmmov 0   ;;  %v1404_v1 = vmov 0.0   ;;  %v489_v2 = vld [vmem:[#allocation9] sm:$0xff] }
  0xa9   : > { %1000 = vmatprep.subr.bf16.mxu1 %v1402_v0  ;;  %938 = vmatprep.mubr.msk.f32.mxu1 %vm1403_vm0, %v1404_v1  ;;  %v490_v3 = vld [vmem:[#allocation9 + $0x8] sm:$0xff]  ;;  %v491_v4 = vld [vmem:[#allocation9 + $0x10] sm:$0xff]  ;;  %v492_v6 = vld [vmem:[#allocation9 + $0x18] sm:$0xff]  ;;  %s364_s13 = sand.u32 1, %s1377_s25   ;;  %s1819_s16 = sld [smem:[#allocation27_spill]] }
  0xaa   : > { %976 = vmatprep.subr.bf16.mxu0 %v1402_v0  ;;  %903 = vmatprep.mubr.msk.f32.mxu0 %vm1403_vm0, %v1404_v1  ;;  %v1001_v5 = vpack.c.bf16 %v490_v3, %v489_v2  ;;  %v1004_v7 = vpack.c.bf16 %v492_v6, %v491_v4  ;;  %v493_v8 = vld [vmem:[#allocation9 + $0x20] sm:$0xff]  ;;  %v494_v9 = vld [vmem:[#allocation9 + $0x28] sm:$0xff]  ;;  %v396_v14 = vld [vmem:[#allocation10 + $0x10] sm:$0xff]  ;;  %s812_s22 = sshll.u32 %s364_s13, 3  ;;  %s674_s23 = scalar_lea.sflag [#allocation6], %s364_s13 }
  0xab   : > { %v394_v10 = vld [vmem:[#allocation10] sm:$0xff]  ;;  %v395_v11 = vld [vmem:[#allocation10 + $0x8] sm:$0xff]  ;;  %v1007_v12 = vpack.c.bf16 %v494_v9, %v493_v8  ;;  %v397_v15 = vld [vmem:[#allocation10 + $0x18] sm:$0xff]  ;;  %s366_s8 = scalar_lea.vmem [#allocation13], %s812_s22  ;;  %p1820_p6 = scmp.ne.s32.totalorder %s1801_s14, 0 }
  0xac   : > { %1002 = vmatpush3.bf16.msra.mxu1 %v1001_v5  ;;  %v977_v13 = vpack.c.bf16 %v395_v11, %v394_v10  ;;  %v495_v16 = vld [vmem:[#allocation9 + $0x30] sm:$0xff]  ;;  %v496_v17 = vld [vmem:[#allocation9 + $0x38] sm:$0xff]  ;;  %v980_v18 = vpack.c.bf16 %v397_v15, %v396_v14  ;;  %v398_v19 = vld [vmem:[#allocation10 + $0x20] sm:$0xff]  ;;  %s687_s27 = sshll.u32 %s366_s8, 4  ;;  %s1405_s1 = smov [#allocation13]   ;;  %s1718_s27 = int_to_ptr.vmem [resolvable:$true] %s687_s27 }
  0xad   : > { %1003 = vmatprep.subr.bf16.mxu1 %v1402_v0  ;;  %v399_v20 = vld [vmem:[#allocation10 + $0x28] sm:$0xff]  ;;  %v1010_v21 = vpack.c.bf16 %v496_v17, %v495_v16  ;;  %v497_v22 = vld [vmem:[#allocation9 + $0x40] sm:$0xff]  ;;  %v400_v25 = vld [vmem:[#allocation10 + $0x30] sm:$0xff]  ;;  %s1299_s10 = scalar_lea.vmem %s1718_s27, 128  ;;  %s1303_s7 = sshll.u32 %s1405_s1, 4  ;;  %s1304_s7 = int_to_ptr.vmem [resolvable:$false] %s1303_s7 }
  0xae   : > { %978 = vmatpush3.bf16.msra.mxu0 %v977_v13  ;;  %v498_v23 = vld [vmem:[#allocation9 + $0x48] sm:$0xff]  ;;  %v983_v24 = vpack.c.bf16 %v399_v20, %v398_v19  ;;  %v401_v26 = vld [vmem:[#allocation10 + $0x38] sm:$0xff]  ;;  %v499_v28 = vld [vmem:[#allocation9 + $0x50] sm:$0xff]  ;;  %p1300_p7 = scmp.ne.s32.totalorder %s1718_s27, %s1299_s10  ;;  %s1305_s24 = scalar_lea.vmem %s1304_s7, 256 }
  0xaf   : > { %979 = vmatprep.subr.bf16.mxu0 %v1402_v0  ;;  %v1013_v27 = vpack.c.bf16 %v498_v23, %v497_v22  ;;  %v500_v29 = vld [vmem:[#allocation9 + $0x58] sm:$0xff]  ;;  %v986_v30 = vpack.c.bf16 %v401_v26, %v400_v25  ;;  %v402_v31 = vld [vmem:[#allocation10 + $0x40] sm:$0xff]  ;;  %v403_v32 = vld [vmem:[#allocation10 + $0x48] sm:$0xff]  ;;  %s1716_s20 = scalar_lea.hbm %s1819_s16, %s1509_s17  ;;  %p1306_p5 = scmp.lt.s32.totalorder %s1718_s27, %s1304_s7 }
  0xb0   : > { %1005 = vmatpush3.bf16.msra.mxu1 %v1004_v7  ;;  %v1016_v33 = vpack.c.bf16 %v500_v29, %v499_v28  ;;  %v372_v34 = vld [vmem:[#allocation4] sm:$0xff]  ;;  %v373_v35 = vld [vmem:[#allocation7] sm:$0xff]  ;;  %v501_v36 = vld [vmem:[#allocation9 + $0x60] sm:$0xff]  ;;  %v989_v38 = vpack.c.bf16 %v403_v32, %v402_v31  ;;  %p1301_p8 = pnand %p1300_p7, %p1820_p6  ;;  %p1307_p10 = scmp.lt.s32.totalorder %s1305_s24, %s1299_s10 }
  0xb1   : > { %1006 = vmatprep.subr.bf16.mxu1 %v1402_v0  ;;  %v502_v37 = vld [vmem:[#allocation9 + $0x68] sm:$0xff]  ;;  %v374_v39 = vsub.f32 %v373_v35, %v372_v34  ;;  %v404_v40 = vld [vmem:[#allocation10 + $0x50] sm:$0xff]  ;;  %v405_v41 = vld [vmem:[#allocation10 + $0x58] sm:$0xff] }
  0xb2   : > { %981 = vmatpush3.bf16.msra.mxu0 %v980_v18  ;;  %v1019_v42 = vpack.c.bf16 %v502_v37, %v501_v36  ;;  %v813_v43 = vld [vmem:[%s1765_s2] ss:$0 sm:$0xff]  ;;  %v504_v45 = vld [vmem:[#allocation9 + $0x78] sm:$0xff]  ;;  %v992_v46 = vpack.c.bf16 %v405_v41, %v404_v40  ;;  %v406_v48 = vld [vmem:[#allocation10 + $0x60] sm:$0xff]  ;;  %p1302_p9 = pneg %p1301_p8  ;;  %p1308_p11 = por %p1307_p10, %p1306_p5 }
  0xb3   : > { %982 = vmatprep.subr.bf16.mxu0 %v1402_v0  ;;  %v503_v44 = vld [vmem:[#allocation9 + $0x70] sm:$0xff]  ;;  %v382_v47 = vmul.f32 %v813_v43, %v374_v39  ;;  %v407_v49 = vld [vmem:[#allocation10 + $0x68] sm:$0xff]  ;;  %v409_v55 = vld [vmem:[#allocation10 + $0x78] sm:$0xff] }
  0xb4   : > { %1008 = vmatpush3.bf16.msra.mxu1 %v1007_v12  ;;  %v1022_v50 = vpack.c.bf16 %v504_v45, %v503_v44  ;;  %v995_v51 = vpack.c.bf16 %v407_v49, %v406_v48  ;;  %v814_v52 = vld [vmem:[%s1766_s3] ss:$0 sm:$0xff]  ;;  %v578_v58 = vld [vmem:[#allocation12] sm:$0xff]  ;;  %v579_v59 = vld [vmem:[#allocation12 + $0x8] sm:$0xff]  ;;  %p1309_p0 = pnand %p1308_p11, %p1302_p9 }
  0xb5   : > { %1009 = vmatprep.subr.bf16.mxu1 %v1402_v0  ;;  %v383_v53 = vadd.f32 %v382_v47, %v372_v34  ;;  %v408_v54 = vld [vmem:[#allocation10 + $0x70] sm:$0xff]  ;;  %v391_v56 = vmul.f32 %v814_v52, %v374_v39  ;;  %v1025_v61 = vpack.c.bf16 %v579_v59, %v578_v58  ;;  %v581_v63 = vld [vmem:[#allocation12 + $0x18] sm:$0xff]  ;;  %v582_v3 = vld [vmem:[#allocation12 + $0x20] sm:$0xff] }
  0xb6   : > { %984 = vmatpush3.bf16.msra.mxu0 %v983_v24  ;;  %v998_v57 = vpack.c.bf16 %v409_v55, %v408_v54  ;;  %v580_v62 = vld [vmem:[#allocation12 + $0x10] sm:$0xff]  ;;  %v583_v4 = vld [vmem:[#allocation12 + $0x28] sm:$0xff]  ;;  %v585_v7 = vld [vmem:[#allocation12 + $0x38] sm:$0xff] }
  0xb7   : > { %985 = vmatprep.subr.bf16.mxu0 %v1402_v0  ;;  %v392_v60 = vadd.f32 %v391_v56, %v372_v34  ;;  %v1028_v2 = vpack.c.bf16 %v581_v63, %v580_v62  ;;  %v1031_v5 = vpack.c.bf16 %v583_v4, %v582_v3  ;;  %v584_v6 = vld [vmem:[#allocation12 + $0x30] sm:$0xff]  ;;  %v586_v9 = vld [vmem:[#allocation12 + $0x40] sm:$0xff]  ;;  %v587_v10 = vld [vmem:[#allocation12 + $0x48] sm:$0xff] }
  0xb8   : > { %1011 = vmatpush3.bf16.msra.mxu1 %v1010_v21  ;;  %v1034_v8 = vpack.c.bf16 %v585_v7, %v584_v6  ;;  %v1037_v11 = vpack.c.bf16 %v587_v10, %v586_v9  ;;  %v589_v12 = vld [vmem:[#allocation12 + $0x58] sm:$0xff]  ;;  %v590_v14 = vld [vmem:[#allocation12 + $0x60] sm:$0xff]  ;;  %v591_v15 = vld [vmem:[#allocation12 + $0x68] sm:$0xff] }
  0xb9   : > { %1012 = vmatprep.subr.bf16.mxu1 %v1402_v0  ;;  %v1043_v16 = vpack.c.bf16 %v591_v15, %v590_v14  ;;  %v592_v17 = vld [vmem:[#allocation12 + $0x70] sm:$0xff]  ;;  %v593_v18 = vld [vmem:[#allocation12 + $0x78] sm:$0xff] }
  0xba   : > { %987 = vmatpush3.bf16.msra.mxu0 %v986_v30  ;;  %v1046_v19 = vpack.c.bf16 %v593_v18, %v592_v17 }
  0xbb   : > { %988 = vmatprep.subr.bf16.mxu0 %v1402_v0 }
  0xbc   : > { %1014 = vmatpush3.bf16.msra.mxu1 %v1013_v27 }
  0xbd   : > { %1015 = vmatprep.subr.bf16.mxu1 %v1402_v0 }
  0xbe   : > { %990 = vmatpush3.bf16.msra.mxu0 %v989_v38 }
  0xbf   : > { %991 = vmatprep.subr.bf16.mxu0 %v1402_v0 }
  0xc0   : > { %1017 = vmatpush3.bf16.msra.mxu1 %v1016_v33 }
  0xc1   : > { %1018 = vmatprep.subr.bf16.mxu1 %v1402_v0 }
  0xc2   : > { %993 = vmatpush3.bf16.msra.mxu0 %v992_v46 }
  0xc3   : > { %994 = vmatprep.subr.bf16.mxu0 %v1402_v0 }
  0xc4   : > { %1020 = vmatpush3.bf16.msra.mxu1 %v1019_v42 }
  0xc5   : > { %1021 = vmatprep.subr.bf16.mxu1 %v1402_v0 }
  0xc6   : > { %996 = vmatpush3.bf16.msra.mxu0 %v995_v51 }
  0xc7   : > { %997 = vmatprep.subr.bf16.mxu0 %v1402_v0 }
  0xc8   : > { %1023 = vmatpush3.bf16.msra.mxu1 %v1022_v50 }
  0xca   : > { %999 = vmatpush3.bf16.msra.mxu0 %v998_v57 }
  0xcb   : > { %939 = vmatmul.mubr.f32.vlgmr.msra.gmra.mrb[0].mxu1 %v383_v53  ;;  %1024 = vmatprep.subr.bf16.mxu0 %v1402_v0 }
  0xcd   : > { %904 = vmatmul.mubr.f32.vlgmr.msra.gmra.mrb[0].mxu0 %v392_v60 }
  0xce   : > { %1026 = vmatpush3.bf16.msra.mxu0 %v1025_v61  ;;  %973 = vmatprep.mubr.msk.f32.mxu0 %vm1403_vm0, %v1404_v1  ;;  %v588_v1 = vld [vmem:[#allocation12 + $0x50] sm:$0xff] }
  0xcf   : > { %1027 = vmatprep.subr.bf16.mxu0 %v1402_v0  ;;  %v1040_v13 = vpack.c.bf16 %v589_v12, %v588_v1 }
  0xd2   : > { %1029 = vmatpush3.bf16.msra.mxu0 %v1028_v2 }
  0xd3   : > { %1030 = vmatprep.subr.bf16.mxu0 %v1402_v0 }
  0xd6   : > { %1032 = vmatpush3.bf16.msra.mxu0 %v1031_v5 }
  0xd7   : > { %1033 = vmatprep.subr.bf16.mxu0 %v1402_v0 }
  0xda   : > { %1035 = vmatpush3.bf16.msra.mxu0 %v1034_v8 }
  0xdb   : > { %1036 = vmatprep.subr.bf16.mxu0 %v1402_v0 }
  0xde   : > { %1038 = vmatpush3.bf16.msra.mxu0 %v1037_v11 }
  0xdf   : > { %1039 = vmatprep.subr.bf16.mxu0 %v1402_v0 }
  0xe2   : > { %1041 = vmatpush3.bf16.msra.mxu0 %v1040_v13 }
  0xe3   : > { %1042 = vmatprep.subr.bf16.mxu0 %v1402_v0 }
  0xe6   : > { %1044 = vmatpush3.bf16.msra.mxu0 %v1043_v16 }
  0xe7   : > { %1045 = vmatprep.subr.bf16.mxu0 %v1402_v0 }
  0xea   : > { %1047 = vmatpush3.bf16.msra.mxu0 %v1046_v19 }
 0x19e   : > { %v571_v20 = vpop.f32.mrb[0].mxu1 }
 0x19f   : > { %v575_v21 = vmax.f32 %v571_v20, 0.0  ;;  %v940_v22 = vpop.f32.mrb[1].mxu1 }
 0x1a0   : > { %v476_v24 = vpop.f32.mrb[0].mxu0 }
 0x1a1   : > { %v576_v23 = vmul.f32 %v575_v21, %v575_v21  ;;  %v905_v25 = vpop.f32.mrb[1].mxu0  ;;  %v815_v26 = vmul.f32 -1.442695, %v476_v24 }
 0x1a3   : > { %974 = vmatmul.mubr.f32.vlgmr.msra.gmra.mrb[2].mxu0 %v576_v23  ;;  %1151 = vpow2.f32 %v815_v26 }
 0x1ad   : > { %v1152_v27 = vpop.eup %1151 }
 0x1ae   : > { %v483_v28 = vadd.f32 1.0, %v1152_v27 }
 0x1b0   : > { %1153 = vrcp.f32 %v483_v28 }
 0x1ba   : > { %v1154_v30 = vpop.eup %1153 }
 0x276   : > { %v660_v0 = vpop.f32.mrb[2].mxu0 }
 0x277   : > { %v975_v29 = vpop.f32.mrb[3].mxu0  ;;  %v671_v31 = vmul.f32 %v1154_v30, %v660_v0 }
 0x279   : > { %672 = vst [vmem:[%s366_s8] sm:$0xff] %v671_v31 }
 0x27a   : > { %1312 = shalt.err (!%p1309_p0)
}
 0x27b   : > { %s1313_s17 = scalar_lea.hbm %s1716_s20, 128  ;;  %s1317_s18 = scalar_lea.hbm %s1819_s16, 256 }
 0x27c   : > { %p1314_p2 = scmp.ne.s32.totalorder %s1716_s20, %s1313_s17  ;;  %p1318_p12 = scmp.lt.u32.totalorder %s1716_s20, %s1819_s16 }
 0x27d   : > { %p1319_p13 = scmp.lt.u32.totalorder %s1317_s18, %s1313_s17  ;;  %p1321_p7 = scmp.lt.u32.totalorder %s1313_s17, %s1716_s20 }
 0x27e   : > { %p1315_p4 = pnand %p1314_p2, %p1820_p6 }
 0x27f   : > { %p1320_p3 = por %p1319_p13, %p1318_p12 }
 0x280   : > { %p1316_p1 = pneg %p1315_p4 }
 0x281   : > { %p1322_p8 = por %p1321_p7, %p1320_p3 }
 0x283   : > { %p1323_p9 = pnand %p1322_p8, %p1316_p1 }
 0x285   : > { %1326 = shalt.err (!%p1323_p9)
}
 0x286   : > { %1064 = dma.vmem_to_hbm [thread:$0]  (%p1820_p6), %s1718_s27, 128, %s1716_s20, %s674_s23  }
 0x287 PF: > { %s1821_s11 = sld [smem:[#allocation22_spill]]  ;;  %s1822_s12 = sld [smem:[#allocation19_spill]] }
 0x288   : > { %s1823_s21 = sld [smem:[#allocation24_spill]] }
 0x28d   : > { %p1092_p5 = scmp.ge.s32.totalorder %s1821_s11, 2  ;;  %s699_s30 = sand.u32 1, %s1822_s12  }
 0x28e   : > { %p1824_p10 = scmp.ne.s32.totalorder %s1823_s21, 0  ;;  %s700_s13 = scalar_lea.sflag [#allocation6], %s699_s30 }
 0x290   : > { %p1083_p11 = pnand %p1092_p5, %p1824_p10 }
 0x292   : > { %1368 = dma.done.wait (!%p1083_p11), %s700_s13, 128  }
 0x293   : > { %1370 = vsyncadd (!%p1083_p11), %s700_s13, 4294967168  ;;  %s23_s29 = sadd.s32 1, %s1821_s11   ;;  %s1825_s22 = sld [smem:[#allocation20_spill]] }
 0x294   : > { %p20_p0 = scmp.ge.s32.totalorder %s23_s29, 4   ;;  %s1826_s26 = sld [smem:[#allocation25_spill]] }
 0x295   : > { %s1827_s27 = sld [smem:[#allocation21_spill]]  ;;  %s1828_s28 = sld [smem:[#allocation23_spill]] }
 0x296   : > { %s1829_s24 = smov %s1377_s25  ;;  %22 = sbr.rel (!%p20_p0) target bundleno = 10 (0xa), region = 113 }
 0x299   : > { %s1830_s25 = smov %s1825_s22 }
 0x29d   :  { %705 = vsyncpa [#allocation5], 1 }
 0x29e   :  { %707 = vsyncpa [#allocation5 + $0x1], 1 }
 0x29f   :  { %708 = vsyncpa [#allocation8], 1 }
 0x2a0   :  { %709 = vsyncpa [#allocation11], 1 }
 0x2a1   :  { %710 = vsyncpa [#allocation6], 1 }
 0x2a2   :  { %712 = vsyncpa [#allocation6 + $0x1], 1 }

// kernel: tpu_custom_call.1
= control target key start
LH: loop header
LB: loop body
LE: loop exit
PB: predicated region body
PF: predicated region fallthrough
CT: control target
= control target key end

     0   :  { %s1866_s0 = inlined_call_operand.hbm [shape: f32[16,128], index: 0, kind: input, shape index: {}]   ;;  %s1867_s1 = inlined_call_operand.hbm [shape: f32[16,128], index: 1, kind: input, shape index: {}]   ;;  %s1868_s2 = inlined_call_operand.vmem [shape: f32[1,128], index: 2, kind: input, shape index: {}]   ;;  %s1869_s3 = inlined_call_operand.vmem [shape: f32[1,128], index: 3, kind: input, shape index: {}]   ;;  %s1870_s4 = inlined_call_operand.hbm [shape: f32[128,128], index: 4, kind: input, shape index: {}]   ;;  %s1871_s5 = inlined_call_operand.hbm [shape: f32[128,128], index: 5, kind: input, shape index: {}]   ;;  %s1872_s6 = inlined_call_operand.hbm [shape: f32[128,128], index: 6, kind: input, shape index: {}]   ;;  %s1873_s7 = inlined_call_operand.hbm [shape: f32[16,128], index: 7, kind: output, shape index: {}]  }
   0x1   :  { %1881 = sst [smem:[#allocation21_spill]] %s1870_s4 }
   0x2   :  { %1882 = sst [smem:[#allocation22_spill]] %s1871_s5 }
   0x3   :  { %1883 = sst [smem:[#allocation23_spill]] %s1872_s6 }
   0x4   :  { %1884 = sst [smem:[#allocation24_spill]] %s1873_s7 }
   0x5   :  { %12 = vsyncpa [#allocation5], 0 }
   0x6   :  { %14 = vsyncpa [#allocation5 + $0x1], 0 }
   0x7   :  { %15 = vsyncpa [#allocation8], 0 }
   0x8   :  { %17 = vsyncpa [#allocation8 + $0x1], 0 }
   0x9   :  { %18 = vsyncpa [#allocation11], 0 }
   0xa   :  { %19 = vsyncpa [#allocation6], 0 }
   0xb   :  { %21 = vsyncpa [#allocation6 + $0x1], 0  ;;  %s1505_s24 = smov 0   ;;  %s1507_s25 = smov 0  }
   0xc   :  { %s1509_s26 = smov 0   ;;  %s1511_s27 = smov 0  }
   0xd   :  { %s1513_s28 = smov 0   ;;  %s1515_s29 = smov 0  }
   0xe LB: > { %1885 = sst [smem:[#allocation19_spill]] %s1432_s24  ;;  %s1536_s30 = sadd.s32 4294967295, %s1452_s29   ;;  %s1452_s29 = sphi %s1515_s29, %s27_s29   ;;  %s1448_s28 = sphi %s1513_s28, %s1914_s28   ;;  %s1444_s27 = sphi %s1511_s27, %s1913_s27   ;;  %s1440_s26 = sphi %s1509_s26, %s1912_s26   ;;  %s1436_s25 = sphi %s1507_s25, %s1911_s25   ;;  %s1432_s24 = sphi %s1505_s24, %s1910_s24  }
   0xf   : > { %s855_s8 = sadd.s32 4294967294, %s1452_s29   ;;  %p59_p0 = scmp.ne.s32.totalorder %s1436_s25, %s1432_s24 }
  0x10   : > { %p1874_p1 = scmp.eq.s32.totalorder %s1536_s30, 0  ;;  %p230_p3 = scmp.eq.s32.totalorder %s855_s8, 1 }
  0x11   : > { %p856_p5 = scmp.ge.s32.totalorder %s1452_s29, 1  ;;  %p237_p7 = scmp.lt.s32.totalorder %s1452_s29, 3 }
  0x12   : > { %p1545_p4 = por %p1874_p1, %p59_p0  ;;  %p1550_p6 = por %p230_p3, %p59_p0 }
  0x13   : > { %p1555_p8 = pnand %p856_p5, %p237_p7  ;;  %s1454_s12 = smov [#allocation9]  }
  0x14   : > { %s1886_s9 = scalar_select %p1545_p4, 1, 0 }
  0x15   : > { %s1887_s10 = scalar_select %p1550_p6, 1, 0 }
  0x16   : > { %s1889_s11 = scalar_select %p1555_p8, 1, 0 }
  0x17   : > { %1888 = sst [smem:[#allocation20_spill]] %s1887_s10  ;;  %s257_s13 = sshll.u32 %s1454_s12, 4  ;;  %s1559_s13 = int_to_ptr.vmem [resolvable:$true] %s257_s13 }
  0x18   : > { %p1125_p9 = pneg %p1555_p8  ;;  %s1455_s15 = smov [#allocation10]  }
  0x19   : > { %s270_s16 = sshll.u32 %s1455_s15, 4  ;;  %s1456_s17 = smov [#allocation12]   ;;  %s1570_s16 = int_to_ptr.vmem [resolvable:$true] %s270_s16 }
  0x1a   : > { %p1566_p11 = pnand %p1125_p9, %p1874_p1  ;;  %s1572_s18 = sshll.u32 %s1456_s17, 4  ;;  %s287_s18 = int_to_ptr.vmem [resolvable:$true] %s1572_s18 }
  0x1b   : > { %s1891_s4 = sld [smem:[#allocation21_spill]] }
  0x1c   : > { %p1582_p13 = pneg %p1566_p11 }
  0x21   : > { %s1214_s21 = scalar_lea.hbm %s1891_s4, 2048 }
  0x22   : > { %p1215_p12 = scmp.ne.s32.totalorder %s1891_s4, %s1214_s21  ;;  %p1221_p5 = scmp.lt.u32.totalorder %s1214_s21, %s1891_s4 }
  0x24   : > { %p1217_p0 = pnand %p1582_p13, %p1215_p12 }
  0x26   : > { %p1218_p3 = pneg %p1217_p0 }
  0x28   : > { %p1223_p7 = pnand %p1221_p5, %p1218_p3 }
  0x2a   : > { %1226 = shalt.err (!%p1223_p7)
}
  0x2b   : > { %s1227_s17 = scalar_lea.vmem %s1559_s13, 2048  ;;  %p1235_p2 = scmp.lt.s32.totalorder %s1559_s13, %s1559_s13 }
  0x2c   : > { %p1228_p9 = scmp.ne.s32.totalorder %s1559_s13, %s1227_s17  ;;  %p1236_p6 = scmp.lt.s32.totalorder %s1227_s17, %s1227_s17 }
  0x2e   : > { %p1230_p10 = pnand %p1228_p9, %p1582_p13  ;;  %p1237_p12 = por %p1236_p6, %p1235_p2 }
  0x30   : > { %p1231_p1 = pneg %p1230_p10 }
  0x32   : > { %p1238_p0 = pnand %p1237_p12, %p1231_p1 }
  0x34   : > { %1241 = shalt.err (!%p1238_p0)
}
  0x35   : > { %s1457_s19 = smov 128   ;;  %s1458_s20 = smov 8  }
  0x36   : > { %1128 = dma.hbm_to_vmem [thread:$0]  (!%p1566_p11), %s1891_s4, 2048, %s1559_s13, [#allocation8], %s1457_s19, %s1457_s19, %s1458_s20  }
  0x37   : > { %s1893_s5 = sld [smem:[#allocation22_spill]] }
  0x3d   : > { %s1242_s15 = scalar_lea.hbm %s1893_s5, 2048 }
  0x3e   : > { %p1243_p1 = scmp.ne.s32.totalorder %s1893_s5, %s1242_s15  ;;  %p1249_p10 = scmp.lt.u32.totalorder %s1242_s15, %s1893_s5 }
  0x40   : > { %p1245_p2 = pnand %p1243_p1, %p1582_p13 }
  0x42   : > { %p1246_p6 = pneg %p1245_p2 }
  0x44   : > { %p1251_p3 = pnand %p1249_p10, %p1246_p6 }
  0x46   : > { %1254 = shalt.err (!%p1251_p3)
}
  0x47   : > { %s1255_s13 = scalar_lea.vmem %s1570_s16, 2048  ;;  %p1263_p12 = scmp.lt.s32.totalorder %s1570_s16, %s1570_s16 }
  0x48   : > { %p1256_p5 = scmp.ne.s32.totalorder %s1570_s16, %s1255_s13  ;;  %p1264_p0 = scmp.lt.s32.totalorder %s1255_s13, %s1255_s13 }
  0x4a   : > { %p1258_p7 = pnand %p1256_p5, %p1582_p13  ;;  %p1265_p1 = por %p1264_p0, %p1263_p12 }
  0x4c   : > { %p1259_p9 = pneg %p1258_p7 }
  0x4e   : > { %p1266_p2 = pnand %p1265_p1, %p1259_p9 }
  0x50   : > { %1269 = shalt.err (!%p1266_p2)
}
  0x51   : > { %1131 = dma.hbm_to_vmem [thread:$0]  (!%p1566_p11), %s1893_s5, 2048, %s1570_s16, [#allocation11], %s1457_s19, %s1457_s19, %s1458_s20  }
  0x52   : > { %s1894_s6 = sld [smem:[#allocation23_spill]] }
  0x58   : > { %s1270_s22 = scalar_lea.hbm %s1894_s6, 2048 }
  0x59   : > { %p1271_p6 = scmp.ne.s32.totalorder %s1894_s6, %s1270_s22  ;;  %p1277_p5 = scmp.lt.u32.totalorder %s1270_s22, %s1894_s6 }
  0x5b   : > { %p1273_p10 = pnand %p1271_p6, %p1582_p13 }
  0x5d   : > { %p1274_p3 = pneg %p1273_p10 }
  0x5f   : > { %p1279_p7 = pnand %p1277_p5, %p1274_p3 }
  0x61   : > { %1282 = shalt.err (!%p1279_p7)
}
  0x62   : > { %s1283_s13 = scalar_lea.vmem %s287_s18, 2048  ;;  %p1291_p1 = scmp.lt.s32.totalorder %s287_s18, %s287_s18 }
  0x63   : > { %p1284_p9 = scmp.ne.s32.totalorder %s287_s18, %s1283_s13  ;;  %p1292_p2 = scmp.lt.s32.totalorder %s1283_s13, %s1283_s13 }
  0x65   : > { %p1286_p12 = pnand %p1284_p9, %p1582_p13  ;;  %p1293_p4 = por %p1292_p2, %p1291_p1 }
  0x67   : > { %p1287_p0 = pneg %p1286_p12 }
  0x69   : > { %p1294_p8 = pnand %p1293_p4, %p1287_p0 }
  0x6b   : > { %1297 = shalt.err (!%p1294_p8)
}
  0x6c   : > { %1134 = dma.hbm_to_vmem [thread:$0]  (!%p1566_p11), %s1894_s6, 2048, %s287_s18, [#allocation11], %s1457_s19, %s1457_s19, %s1458_s20  }
  0x6d   : > { %s46_s8 = sadd.s32 1, %s1440_s26  ;;  %s39_s14 = sadd.s32 1, %s1448_s28 }
  0x6e   : > { %p53_p4 = scmp.ne.s32.totalorder %s1440_s26, %s1436_s25  ;;  %p41_p8 = scmp.ge.s32.totalorder %s39_s14, 2 }
  0x6f   : > { %p54_p13 = scmp.eq.s32.totalorder %s1452_s29, 0  ;;  %p1895_p6 = scmp.eq.s32.totalorder %s1536_s30, 1 }
  0x70   : > { %p1149_p3 = scmp.lt.s32.totalorder %s1452_s29, 2  ;;  %s1916_s14 = smov (%p41_p8, %s39_s14), 0 }
  0x71   : > { %p1661_p10 = por %p1895_p6, %p53_p4  ;;  %p55_p5 = por %p54_p13, %p53_p4 }
  0x72   : > { %s300_s10 = sand.u32 1, %s1440_s26   ;;  %s43_s21 = ssub.s32 %s1448_s28, %s1916_s14 }
  0x73   : > { %s1896_s24 = scalar_select %p1661_p10, 1, 0 }
  0x74   : > { %p44_p11 = scmp.eq.s32.totalorder %s43_s21, 0  ;;  %s1671_s18 = sshll.u32 %s300_s10, 3 }
  0x75   : > { %s862_s19 = sshll.u32 %s1448_s28, 7  ;;  %s304_s15 = scalar_lea.vmem [#allocation4], %s1671_s18 }
  0x76   : > { %s1675_s20 = scalar_select %p44_p11, %s1440_s26, %s46_s8  }
  0x77   : > { %s1680_s12 = scalar_lea.hbm %s1866_s0, %s862_s19  ;;  %s311_s17 = sshll.u32 %s304_s15, 4  ;;  %s1683_s17 = int_to_ptr.vmem [resolvable:$true] %s311_s17 }
  0x78   : > { %p1687_p7 = pnand %p1149_p3, %p55_p5  ;;  %s1694_s8 = scalar_lea.hbm %s1867_s1, %s862_s19 }
  0x79   : > { %s318_s21 = sand.u32 1, %s1452_s29   ;;  %s301_s22 = scalar_lea.sflag [#allocation5], %s300_s10 }
  0x7a   : > { %s1298_s23 = scalar_lea.hbm %s1680_s12, 128  ;;  %p1300_p12 = pneg %p1687_p7 }
  0x7b   : > { %p1299_p9 = scmp.ne.s32.totalorder %s1680_s12, %s1298_s23  ;;  %s1303_s5 = scalar_lea.hbm %s1866_s0, 256 }
  0x7c   : > { %p1304_p2 = scmp.lt.u32.totalorder %s1680_s12, %s1866_s0  ;;  %p1305_p4 = scmp.lt.u32.totalorder %s1303_s5, %s1298_s23 }
  0x7d   : > { %p1301_p0 = pnand %p1300_p12, %p1299_p9  ;;  %p1307_p13 = scmp.lt.u32.totalorder %s1298_s23, %s1680_s12 }
  0x7e   : > { %p1306_p8 = por %p1305_p4, %p1304_p2 }
  0x7f   : > { %p1302_p1 = pneg %p1301_p0 }
  0x80   : > { %p1308_p6 = por %p1307_p13, %p1306_p8 }
  0x82   : > { %p1309_p3 = pnand %p1308_p6, %p1302_p1 }
  0x84   : > { %1312 = shalt.err (!%p1309_p3)
}
  0x85   : > { %s1313_s10 = scalar_lea.vmem %s1683_s17, 128  ;;  %s1459_s4 = smov [#allocation4]  }
  0x86   : > { %p1314_p5 = scmp.ne.s32.totalorder %s1683_s17, %s1313_s10  ;;  %s1318_s19 = sshll.u32 %s1459_s4, 4  ;;  %s1319_s19 = int_to_ptr.vmem [resolvable:$false] %s1318_s19 }
  0x87   : > { %s1320_s6 = scalar_lea.vmem %s1319_s19, 256  ;;  %p1321_p0 = scmp.lt.s32.totalorder %s1683_s17, %s1319_s19 }
  0x88   : > { %p1316_p11 = pnand %p1314_p5, %p1300_p12  ;;  %p1322_p2 = scmp.lt.s32.totalorder %s1320_s6, %s1313_s10 }
  0x8a   : > { %p1317_p9 = pneg %p1316_p11  ;;  %p1323_p4 = por %p1322_p2, %p1321_p0 }
  0x8c   : > { %p1324_p8 = pnand %p1323_p4, %p1317_p9 }
  0x8e   : > { %1327 = shalt.err (!%p1324_p8)
}
  0x8f   : > { %1138 = dma.hbm_to_vmem [thread:$0]  (!%p1687_p7), %s1680_s12, 128, %s1683_s17, %s301_s22  }
  0x90   : > { %s322_s5 = scalar_lea.vmem [#allocation7], %s1671_s18  ;;  %s319_s23 = scalar_lea.sflag [#allocation8], %s318_s21 }
  0x91   : > { %s329_s7 = sshll.u32 %s322_s5, 4  ;;  %s1328_s15 = scalar_lea.hbm %s1694_s8, 128  ;;  %s330_s7 = int_to_ptr.vmem [resolvable:$true] %s329_s7 }
  0x92   : > { %p1329_p1 = scmp.ne.s32.totalorder %s1694_s8, %s1328_s15  ;;  %s1333_s4 = scalar_lea.hbm %s1867_s1, 256 }
  0x93   : > { %p1334_p3 = scmp.lt.u32.totalorder %s1694_s8, %s1867_s1  ;;  %p1335_p5 = scmp.lt.u32.totalorder %s1333_s4, %s1328_s15 }
  0x94   : > { %p1331_p13 = pnand %p1329_p1, %p1300_p12  ;;  %p1337_p9 = scmp.lt.u32.totalorder %s1328_s15, %s1694_s8 }
  0x95   : > { %p1336_p11 = por %p1335_p5, %p1334_p3 }
  0x96   : > { %p1332_p6 = pneg %p1331_p13 }
  0x97   : > { %p1338_p0 = por %p1337_p9, %p1336_p11 }
  0x99   : > { %p1339_p2 = pnand %p1338_p0, %p1332_p6 }
  0x9b   : > { %1342 = shalt.err (!%p1339_p2)
}
  0x9c   : > { %s1343_s18 = scalar_lea.vmem %s330_s7, 128  ;;  %s1460_s12 = smov [#allocation7]  }
  0x9d   : > { %p1344_p4 = scmp.ne.s32.totalorder %s330_s7, %s1343_s18  ;;  %s1348_s17 = sshll.u32 %s1460_s12, 4  ;;  %s1349_s17 = int_to_ptr.vmem [resolvable:$false] %s1348_s17 }
  0x9e   : > { %s1350_s21 = scalar_lea.vmem %s1349_s17, 256  ;;  %p1351_p13 = scmp.lt.s32.totalorder %s330_s7, %s1349_s17 }
  0x9f   : > { %p1346_p8 = pnand %p1344_p4, %p1300_p12  ;;  %p1352_p10 = scmp.lt.s32.totalorder %s1350_s21, %s1343_s18 }
  0xa1   : > { %p1347_p1 = pneg %p1346_p8  ;;  %p1353_p3 = por %p1352_p10, %p1351_p13 }
  0xa3   : > { %p1354_p5 = pnand %p1353_p3, %p1347_p1 }
  0xa5   : > { %1357 = shalt.err (!%p1354_p5)
}
  0xa6   : > { %1141 = dma.hbm_to_vmem [thread:$0]  (!%p1687_p7), %s1694_s8, 128, %s330_s7, %s319_s23  }
  0xa7   : > { %p1898_p6 = scmp.ne.s32.totalorder %s1889_s11, 0 }
  0xa8   : > { %s1747_s22 = sand.u32 (!%p1898_p6), 1, %s1436_s25   ;;  %p1899_p10 = scmp.ne.s32.totalorder (!%p1898_p6), %s1886_s9, 0 }
  0xa9   : > { %338 = sbr.rel (%p1898_p6) target bundleno = 664 (0x298), region = 48  ;;  %s1750_s5 = sshll.u32 (!%p1898_p6), %s1747_s22, 3 }
  0xaa   : > { %s341_s15 = scalar_lea.sflag (!%p1898_p6), [#allocation5], %s1747_s22  ;;  %s344_s16 = scalar_lea.vmem (!%p1898_p6), [#allocation4], %s1750_s5 }
  0xb0   : > { %1411 = dma.done.wait (%p1899_p10), %s341_s15, 128  }
  0xb1   : > { %1413 = vsyncadd (%p1899_p10), %s341_s15, 4294967168  ;;  %s349_s11 = sand.u32 1, %s1536_s30   ;;  %s353_s8 = scalar_lea.vmem [#allocation7], %s1750_s5 }
  0xb2   : > { %s350_s13 = scalar_lea.sflag [#allocation8], %s349_s11 }
  0xb3   : > { %1415 = dma.done.wait (%p1899_p10), %s350_s13, 128  }
  0xb4   : > { %1417 = vsyncadd (%p1899_p10), %s350_s13, 4294967168  ;;  %p1900_p7 = scmp.eq.s32.totalorder %s1536_s30, 0 }
  0xb6   : > { %1419 = dma.done.wait (%p1900_p7), [#allocation8], 2048   ;;  %p1901_p12 = pmov %p1900_p7 }
  0xb7   : > { %p1902_p11 = pmov %p1900_p7 }
  0xb8   : > { %1421 = vsyncadd (%p1901_p12), [#allocation8], 4294965248 }
  0xb9   : > { %1423 = dma.done.wait (%p1902_p11), [#allocation11], 4096   ;;  %p1903_p9 = pmov %p1900_p7 }
  0xba   : > { %v1461_v0 = vmov 0.0|0.0   ;;  %vm1462_vm0 = vmmov 0   ;;  %v1463_v1 = vmov 0.0   ;;  %v523_v2 = vld [vmem:[#allocation9] sm:$0xff]  ;;  %v524_v3 = vld [vmem:[#allocation9 + $0x8] sm:$0xff]  ;;  %v525_v4 = vld [vmem:[#allocation9 + $0x10] sm:$0xff] }
  0xbb   : > { %1425 = vsyncadd (%p1903_p9), [#allocation11], 4294963200  ;;  %1059 = vmatprep.subr.bf16.mxu1 %v1461_v0  ;;  %997 = vmatprep.mubr.msk.f32.mxu1 %vm1462_vm0, %v1463_v1  ;;  %v1060_v5 = vpack.c.bf16 %v524_v3, %v523_v2  ;;  %v526_v6 = vld [vmem:[#allocation9 + $0x18] sm:$0xff]  ;;  %v527_v8 = vld [vmem:[#allocation9 + $0x20] sm:$0xff]  ;;  %s876_s10 = sshll.u32 %s1444_s27, 7  ;;  %s400_s4 = scalar_lea.vmem [#allocation13], %s1750_s5 }
  0xbc   : > { %1035 = vmatprep.subr.bf16.mxu0 %v1461_v0  ;;  %962 = vmatprep.mubr.msk.f32.mxu0 %vm1462_vm0, %v1463_v1  ;;  %v1063_v7 = vpack.c.bf16 %v526_v6, %v525_v4  ;;  %v528_v9 = vld [vmem:[#allocation9 + $0x28] sm:$0xff]  ;;  %v428_v10 = vld [vmem:[#allocation10] sm:$0xff]  ;;  %v430_v14 = vld [vmem:[#allocation10 + $0x10] sm:$0xff]  ;;  %s721_s19 = sshll.u32 %s400_s4, 4  ;;  %s1904_s12 = sld [smem:[#allocation24_spill]]  ;;  %s1819_s19 = int_to_ptr.vmem [resolvable:$true] %s721_s19 }
  0xbd   : > { %1061 = vmatpush3.bf16.msra.mxu1 %v1060_v5  ;;  %v429_v11 = vld [vmem:[#allocation10 + $0x8] sm:$0xff]  ;;  %v1066_v12 = vpack.c.bf16 %v528_v9, %v527_v8  ;;  %v431_v15 = vld [vmem:[#allocation10 + $0x18] sm:$0xff]  ;;  %v529_v16 = vld [vmem:[#allocation9 + $0x30] sm:$0xff]  ;;  %s708_s21 = scalar_lea.sflag [#allocation6], %s1747_s22  ;;  %s1358_s15 = scalar_lea.vmem %s1819_s19, 128 }
  0xbe   : > { %1062 = vmatprep.subr.bf16.mxu1 %v1461_v0  ;;  %v1036_v13 = vpack.c.bf16 %v429_v11, %v428_v10  ;;  %v530_v17 = vld [vmem:[#allocation9 + $0x38] sm:$0xff]  ;;  %v1039_v18 = vpack.c.bf16 %v431_v15, %v430_v14  ;;  %v432_v19 = vld [vmem:[#allocation10 + $0x20] sm:$0xff]  ;;  %v433_v20 = vld [vmem:[#allocation10 + $0x28] sm:$0xff]  ;;  %p1359_p0 = scmp.ne.s32.totalorder %s1819_s19, %s1358_s15  ;;  %p1905_p2 = scmp.ne.s32.totalorder %s1896_s24, 0 }
  0xbf   : > { %v1069_v21 = vpack.c.bf16 %v530_v17, %v529_v16  ;;  %v531_v22 = vld [vmem:[#allocation9 + $0x40] sm:$0xff]  ;;  %v532_v23 = vld [vmem:[#allocation9 + $0x48] sm:$0xff]  ;;  %v1042_v24 = vpack.c.bf16 %v433_v20, %v432_v19  ;;  %v434_v25 = vld [vmem:[#allocation10 + $0x30] sm:$0xff]  ;;  %s1464_s27 = smov [#allocation13]  }
  0xc0   : > { %1037 = vmatpush3.bf16.msra.mxu0 %v1036_v13  ;;  %v435_v26 = vld [vmem:[#allocation10 + $0x38] sm:$0xff]  ;;  %v1072_v27 = vpack.c.bf16 %v532_v23, %v531_v22  ;;  %v533_v28 = vld [vmem:[#allocation9 + $0x50] sm:$0xff]  ;;  %v436_v31 = vld [vmem:[#allocation10 + $0x40] sm:$0xff]  ;;  %p1360_p4 = pnand %p1359_p0, %p1905_p2  ;;  %s1362_s5 = sshll.u32 %s1464_s27, 4  ;;  %s1363_s5 = int_to_ptr.vmem [resolvable:$false] %s1362_s5 }
  0xc1   : > { %1064 = vmatpush3.bf16.msra.mxu1 %v1063_v7  ;;  %1038 = vmatprep.subr.bf16.mxu0 %v1461_v0  ;;  %v534_v29 = vld [vmem:[#allocation9 + $0x58] sm:$0xff]  ;;  %v1045_v30 = vpack.c.bf16 %v435_v26, %v434_v25  ;;  %v437_v32 = vld [vmem:[#allocation10 + $0x48] sm:$0xff]  ;;  %v535_v36 = vld [vmem:[#allocation9 + $0x60] sm:$0xff]  ;;  %p1365_p1 = scmp.lt.s32.totalorder %s1819_s19, %s1363_s5 }
  0xc2   : > { %1065 = vmatprep.subr.bf16.mxu1 %v1461_v0  ;;  %v1075_v33 = vpack.c.bf16 %v534_v29, %v533_v28  ;;  %v406_v34 = vld [vmem:[%s344_s16] sm:$0xff]  ;;  %v407_v35 = vld [vmem:[%s353_s8] sm:$0xff]  ;;  %v1048_v38 = vpack.c.bf16 %v437_v32, %v436_v31  ;;  %s1817_s17 = scalar_lea.hbm %s1904_s12, %s876_s10  ;;  %p1361_p8 = pneg %p1360_p4 }
  0xc3   : > { %v536_v37 = vld [vmem:[#allocation9 + $0x68] sm:$0xff]  ;;  %v408_v39 = vsub.f32 %v407_v35, %v406_v34  ;;  %v438_v40 = vld [vmem:[#allocation10 + $0x50] sm:$0xff]  ;;  %v439_v41 = vld [vmem:[#allocation10 + $0x58] sm:$0xff]  ;;  %s1364_s16 = scalar_lea.vmem %s1363_s5, 256 }
  0xc4   : > { %1040 = vmatpush3.bf16.msra.mxu0 %v1039_v18  ;;  %v1078_v42 = vpack.c.bf16 %v536_v37, %v535_v36  ;;  %v872_v43 = vld [vmem:[%s1868_s2] ss:$0 sm:$0xff]  ;;  %v537_v44 = vld [vmem:[#allocation9 + $0x70] sm:$0xff]  ;;  %v538_v45 = vld [vmem:[#allocation9 + $0x78] sm:$0xff]  ;;  %v1051_v46 = vpack.c.bf16 %v439_v41, %v438_v40  ;;  %p1366_p13 = scmp.lt.s32.totalorder %s1364_s16, %s1358_s15 }
  0xc5   : > { %1067 = vmatpush3.bf16.msra.mxu1 %v1066_v12  ;;  %1041 = vmatprep.subr.bf16.mxu0 %v1461_v0  ;;  %v416_v47 = vmul.f32 %v872_v43, %v408_v39  ;;  %v440_v48 = vld [vmem:[#allocation10 + $0x60] sm:$0xff]  ;;  %v441_v49 = vld [vmem:[#allocation10 + $0x68] sm:$0xff]  ;;  %v1081_v50 = vpack.c.bf16 %v538_v45, %v537_v44  ;;  %v442_v54 = vld [vmem:[#allocation10 + $0x70] sm:$0xff] }
  0xc6   : > { %1068 = vmatprep.subr.bf16.mxu1 %v1461_v0  ;;  %v1054_v51 = vpack.c.bf16 %v441_v49, %v440_v48  ;;  %v873_v52 = vld [vmem:[%s1869_s3] ss:$0 sm:$0xff]  ;;  %v443_v55 = vld [vmem:[#allocation10 + $0x78] sm:$0xff]  ;;  %v613_v59 = vld [vmem:[#allocation12 + $0x8] sm:$0xff]  ;;  %p1367_p3 = por %p1366_p13, %p1365_p1 }
  0xc7   : > { %v417_v53 = vadd.f32 %v416_v47, %v406_v34  ;;  %v425_v56 = vmul.f32 %v873_v52, %v408_v39  ;;  %v1057_v57 = vpack.c.bf16 %v443_v55, %v442_v54  ;;  %v612_v58 = vld [vmem:[#allocation12] sm:$0xff]  ;;  %v614_v62 = vld [vmem:[#allocation12 + $0x10] sm:$0xff]  ;;  %v615_v63 = vld [vmem:[#allocation12 + $0x18] sm:$0xff] }
  0xc8   : > { %1043 = vmatpush3.bf16.msra.mxu0 %v1042_v24  ;;  %v1084_v61 = vpack.c.bf16 %v613_v59, %v612_v58  ;;  %v1087_v2 = vpack.c.bf16 %v615_v63, %v614_v62  ;;  %v616_v3 = vld [vmem:[#allocation12 + $0x20] sm:$0xff]  ;;  %v617_v4 = vld [vmem:[#allocation12 + $0x28] sm:$0xff]  ;;  %v618_v6 = vld [vmem:[#allocation12 + $0x30] sm:$0xff]  ;;  %p1368_p5 = pnand %p1367_p3, %p1361_p8 }
  0xc9   : > { %1070 = vmatpush3.bf16.msra.mxu1 %v1069_v21  ;;  %1044 = vmatprep.subr.bf16.mxu0 %v1461_v0  ;;  %v426_v60 = vadd.f32 %v425_v56, %v406_v34  ;;  %v1090_v5 = vpack.c.bf16 %v617_v4, %v616_v3  ;;  %v619_v7 = vld [vmem:[#allocation12 + $0x38] sm:$0xff]  ;;  %v620_v9 = vld [vmem:[#allocation12 + $0x40] sm:$0xff]  ;;  %v621_v10 = vld [vmem:[#allocation12 + $0x48] sm:$0xff] }
  0xca   : > { %1071 = vmatprep.subr.bf16.mxu1 %v1461_v0  ;;  %v1093_v8 = vpack.c.bf16 %v619_v7, %v618_v6  ;;  %v1096_v11 = vpack.c.bf16 %v621_v10, %v620_v9  ;;  %v623_v12 = vld [vmem:[#allocation12 + $0x58] sm:$0xff]  ;;  %v624_v14 = vld [vmem:[#allocation12 + $0x60] sm:$0xff]  ;;  %v625_v15 = vld [vmem:[#allocation12 + $0x68] sm:$0xff] }
  0xcb   : > { %v1102_v16 = vpack.c.bf16 %v625_v15, %v624_v14  ;;  %v626_v17 = vld [vmem:[#allocation12 + $0x70] sm:$0xff]  ;;  %v627_v18 = vld [vmem:[#allocation12 + $0x78] sm:$0xff] }
  0xcc   : > { %1046 = vmatpush3.bf16.msra.mxu0 %v1045_v30  ;;  %v1105_v19 = vpack.c.bf16 %v627_v18, %v626_v17 }
  0xcd   : > { %1073 = vmatpush3.bf16.msra.mxu1 %v1072_v27  ;;  %1047 = vmatprep.subr.bf16.mxu0 %v1461_v0 }
  0xce   : > { %1074 = vmatprep.subr.bf16.mxu1 %v1461_v0 }
  0xd0   : > { %1049 = vmatpush3.bf16.msra.mxu0 %v1048_v38 }
  0xd1   : > { %1076 = vmatpush3.bf16.msra.mxu1 %v1075_v33  ;;  %1050 = vmatprep.subr.bf16.mxu0 %v1461_v0 }
  0xd2   : > { %1077 = vmatprep.subr.bf16.mxu1 %v1461_v0 }
  0xd4   : > { %1052 = vmatpush3.bf16.msra.mxu0 %v1051_v46 }
  0xd5   : > { %1079 = vmatpush3.bf16.msra.mxu1 %v1078_v42  ;;  %1053 = vmatprep.subr.bf16.mxu0 %v1461_v0 }
  0xd6   : > { %1080 = vmatprep.subr.bf16.mxu1 %v1461_v0 }
  0xd8   : > { %1055 = vmatpush3.bf16.msra.mxu0 %v1054_v51 }
  0xd9   : > { %1082 = vmatpush3.bf16.msra.mxu1 %v1081_v50  ;;  %1056 = vmatprep.subr.bf16.mxu0 %v1461_v0 }
  0xdc   : > { %998 = vmatmul.mubr.f32.vlgmr.msra.gmra.mrb[0].mxu1 %v417_v53  ;;  %1058 = vmatpush3.bf16.msra.mxu0 %v1057_v57 }
  0xdd   : > { %1083 = vmatprep.subr.bf16.mxu0 %v1461_v0 }
  0xdf   : > { %963 = vmatmul.mubr.f32.vlgmr.msra.gmra.mrb[0].mxu0 %v426_v60 }
  0xe0   : > { %1085 = vmatpush3.bf16.msra.mxu0 %v1084_v61  ;;  %1032 = vmatprep.mubr.msk.f32.mxu0 %vm1462_vm0, %v1463_v1  ;;  %v622_v1 = vld [vmem:[#allocation12 + $0x50] sm:$0xff] }
  0xe1   : > { %1086 = vmatprep.subr.bf16.mxu0 %v1461_v0  ;;  %v1099_v13 = vpack.c.bf16 %v623_v12, %v622_v1 }
  0xe4   : > { %1088 = vmatpush3.bf16.msra.mxu0 %v1087_v2 }
  0xe5   : > { %1089 = vmatprep.subr.bf16.mxu0 %v1461_v0 }
  0xe8   : > { %1091 = vmatpush3.bf16.msra.mxu0 %v1090_v5 }
  0xe9   : > { %1092 = vmatprep.subr.bf16.mxu0 %v1461_v0 }
  0xec   : > { %1094 = vmatpush3.bf16.msra.mxu0 %v1093_v8 }
  0xed   : > { %1095 = vmatprep.subr.bf16.mxu0 %v1461_v0 }
  0xf0   : > { %1097 = vmatpush3.bf16.msra.mxu0 %v1096_v11 }
  0xf1   : > { %1098 = vmatprep.subr.bf16.mxu0 %v1461_v0 }
  0xf4   : > { %1100 = vmatpush3.bf16.msra.mxu0 %v1099_v13 }
  0xf5   : > { %1101 = vmatprep.subr.bf16.mxu0 %v1461_v0 }
  0xf8   : > { %1103 = vmatpush3.bf16.msra.mxu0 %v1102_v16 }
  0xf9   : > { %1104 = vmatprep.subr.bf16.mxu0 %v1461_v0 }
  0xfc   : > { %1106 = vmatpush3.bf16.msra.mxu0 %v1105_v19 }
 0x1af   : > { %v605_v20 = vpop.f32.mrb[0].mxu1 }
 0x1b0   : > { %v609_v21 = vmax.f32 %v605_v20, 0.0  ;;  %v999_v22 = vpop.f32.mrb[1].mxu1 }
 0x1b2   : > { %v610_v23 = vmul.f32 %v609_v21, %v609_v21  ;;  %v510_v24 = vpop.f32.mrb[0].mxu0 }
 0x1b3   : > { %v964_v25 = vpop.f32.mrb[1].mxu0  ;;  %v874_v26 = vmul.f32 -1.442695, %v510_v24 }
 0x1b4   : > { %1033 = vmatmul.mubr.f32.vlgmr.msra.gmra.mrb[2].mxu0 %v610_v23 }
 0x1b5   : > { %1210 = vpow2.f32 %v874_v26 }
 0x1bf   : > { %v1211_v27 = vpop.eup %1210 }
 0x1c0   : > { %v517_v28 = vadd.f32 1.0, %v1211_v27 }
 0x1c2   : > { %1212 = vrcp.f32 %v517_v28 }
 0x1cc   : > { %v1213_v30 = vpop.eup %1212 }
 0x287   : > { %v694_v0 = vpop.f32.mrb[2].mxu0 }
 0x288   : > { %v1034_v29 = vpop.f32.mrb[3].mxu0  ;;  %v705_v31 = vmul.f32 %v1213_v30, %v694_v0 }
 0x28a   : > { %706 = vst [vmem:[%s400_s4] sm:$0xff] %v705_v31 }
 0x28b   : > { %1371 = shalt.err (!%p1368_p5)
}
 0x28c   : > { %s1372_s22 = scalar_lea.hbm %s1817_s17, 128  ;;  %s1376_s8 = scalar_lea.hbm %s1904_s12, 256 }
 0x28d   : > { %p1373_p6 = scmp.ne.s32.totalorder %s1817_s17, %s1372_s22  ;;  %p1377_p12 = scmp.lt.u32.totalorder %s1817_s17, %s1904_s12 }
 0x28e   : > { %p1378_p11 = scmp.lt.u32.totalorder %s1376_s8, %s1372_s22  ;;  %p1380_p0 = scmp.lt.u32.totalorder %s1372_s22, %s1817_s17 }
 0x28f   : > { %p1374_p10 = pnand %p1373_p6, %p1905_p2 }
 0x290   : > { %p1379_p9 = por %p1378_p11, %p1377_p12 }
 0x291   : > { %p1375_p7 = pneg %p1374_p10 }
 0x292   : > { %p1381_p4 = por %p1380_p0, %p1379_p9 }
 0x294   : > { %p1382_p8 = pnand %p1381_p4, %p1375_p7 }
 0x296   : > { %1385 = shalt.err (!%p1382_p8)
}
 0x297   : > { %1123 = dma.vmem_to_hbm [thread:$0]  (%p1905_p2), %s1819_s19, 128, %s1817_s17, %s708_s21  }
 0x298 PF: > { %s1906_s7 = sld [smem:[#allocation19_spill]]  ;;  %s1907_s23 = sld [smem:[#allocation20_spill]] }
 0x299   : > { %p1909_p13 = scmp.ge.s32.totalorder %s1452_s29, 2 }
 0x29e   : > { %s733_s10 = sand.u32 1, %s1906_s7   ;;  %p1908_p1 = scmp.ne.s32.totalorder %s1907_s23, 0 }
 0x29f   : > { %s734_s4 = scalar_lea.sflag [#allocation6], %s733_s10 }
 0x2a0   : > { %p1143_p3 = pnand %p1909_p13, %p1908_p1 }
 0x2a2   : > { %1427 = dma.done.wait (!%p1143_p3), %s734_s4, 128  }
 0x2a3   : > { %1429 = vsyncadd (!%p1143_p3), %s734_s4, 4294967168  ;;  %s27_s29 = sadd.s32 1, %s1452_s29   ;;  %s1910_s24 = smov %s1436_s25 }
 0x2a4   : > { %p24_p5 = scmp.ge.s32.totalorder %s27_s29, 4   ;;  %s1911_s25 = smov %s1440_s26 }
 0x2a5   : > { %s1912_s26 = smov %s1675_s20  ;;  %s1913_s27 = smov %s1448_s28 }
 0x2a6   : > { %s1914_s28 = smov %s1916_s14  ;;  %26 = sbr.rel (!%p24_p5) target bundleno = 14 (0xe), region = 128 }
 0x2ad   :  { %739 = vsyncpa [#allocation5], 1 }
 0x2ae   :  { %741 = vsyncpa [#allocation5 + $0x1], 1 }
 0x2af   :  { %742 = vsyncpa [#allocation8], 1 }
 0x2b0   :  { %744 = vsyncpa [#allocation8 + $0x1], 1 }
 0x2b1   :  { %745 = vsyncpa [#allocation11], 1 }
 0x2b2   :  { %746 = vsyncpa [#allocation6], 1 }
 0x2b3   :  { %748 = vsyncpa [#allocation6 + $0x1], 1 }

</bundles_post_ra>
